<compile_context>
chip_gen: v6e
topology: v6e:2x2x1
jax: 0.10.0
libtpu: 0.0.40
codegen_flags: <defaults>
</compile_context>

<pallas_src>
import math
import functools

import jax
import jax.numpy as jnp
from jax.experimental import pallas as pl
from jax.experimental.pallas import tpu as pltpu

_MB = 1024 * 1024


def _round_up(x, m):
    return (x + m - 1) // m * m


def _vmem_limit_bytes():
    """Per-generation VMEM request with headroom (v7x: 64 MiB/TC; v5e/v6e: 128 MiB)."""
    cap = None
    try:
        cap = int(pltpu.get_tpu_info().vmem_capacity_bytes)
    except Exception:
        cap = None
    if not cap:
        cap = 64 * _MB  # conservative default == v7x physical VMEM per TensorCore
    return max(32 * _MB, min(int(cap * 0.85), 100 * _MB))


def _pick_row_tile(OH, WP, Cin, KKCin, Coutp, out_itemsize, vmem_limit):
    """Largest multiple-of-8 divisor of OH whose working set fits the VMEM budget."""
    lane = lambda c: max(_round_up(c, 128), 128)
    # VMEM bytes per output row (one padded row of W), including lane padding
    # and double-buffering of every pipelined operand; im2col scratch is single.
    per_row = (2 * WP * lane(Cin) * 2                 # x tile (bf16), double-buffered
               + WP * lane(KKCin) * 2                 # im2col slab scratch (bf16)
               + 2 * WP * lane(Coutp) * out_itemsize  # output block, double-buffered
               + 2 * WP * lane(1) * 4)                # noise column (f32), double-buffered
    w_bytes = 2 * _round_up(KKCin, 16) * lane(Coutp) * 2   # weight block (bf16)
    budget = int(vmem_limit * 0.8) - w_bytes
    rows = max(budget // per_row, 8)
    if rows >= OH:
        return OH
    best = 0
    d = 8
    while d <= rows:
        if OH % d == 0:
            best = d
        d += 8
    return best if best else OH


def _styled_conv_kernel(x_ref, w_ref, nz_ref, b_ref, o_ref, slab_ref, *,
                        K, WP, M_wide, Cin, neg_slope, act_scale):
    # x_ref   : (1, 1, M_in, Cin)    bf16  row tile of the flattened padded input (+halo)
    # w_ref   : (1, K*K*Cin, Coutp)  bf16  modulated/demodulated weight, this batch
    # nz_ref  : (1, M_wide, 1)       f32   noise * noise_strength, flattened rows
    # b_ref   : (1, Coutp)           f32   FusedLeakyReLU bias
    # o_ref   : (1, M_wide, Coutp)   out dtype ("wide" rows, K-1 junk cols per row)
    # slab_ref: (M_wide, K*K*Cin)    bf16  VMEM im2col scratch
    for kh in range(K):                       # static unroll: K*K contiguous row slices
        for kw in range(K):
            t = kh * K + kw
            off = kh * WP + kw                # tap offset in flattened coordinates
            slab_ref[:, t * Cin:(t + 1) * Cin] = x_ref[0, 0, off:off + M_wide, :]

    # One MXU contraction of depth K*K*Cin.
    y = jnp.dot(slab_ref[...], w_ref[0], preferred_element_type=jnp.float32)

    # Fused NoiseInjection + FusedLeakyReLU (scale folded into the select).
    y = y + nz_ref[0] + b_ref[...]
    y = jnp.where(y >= 0.0, act_scale * y, (act_scale * neg_slope) * y)
    o_ref[...] = y[None].astype(o_ref.dtype)


def styled_conv(x, style, conv_weight, mod_weight, mod_bias, noise, noise_weight,
                act_bias, *, demodulate=True, eps=1e-8, negative_slope=0.2,
                act_scale=math.sqrt(2.0), row_tile=None, out_dtype=None,
                channels_last_out=False):
    """StyledConv forward (default path).  x: (B, Cin, H, W) NCHW -> (B, Cout, H, W)."""
    B, Cin, H, W = x.shape
    _, Cout, Cin_w, K, K2 = conv_weight.shape
    assert Cin == Cin_w and K == K2 and K % 2 == 1
    style_dim = mod_weight.shape[1]
    pad = K // 2
    OH, OW = H, W                       # stride 1, 'same' padding
    WP = W + 2 * pad                    # padded row width == OW + K - 1
    HP = H + 2 * pad
    KK = K * K
    KKCin = KK * Cin

    out_dtype = x.dtype if out_dtype is None else out_dtype
    out_itemsize = jnp.dtype(out_dtype).itemsize
    # Lane-dense Cout only when the padding overhead is bounded (review: gate on
    # Cout >= 64); below that, padding to 128 is up to 16x HBM write amplification.
    Coutp = _round_up(Cout, 128) if Cout >= 64 else Cout

    # -------- plain-JAX parameter glue (tiny): modulation + demodulation --------
    mod_scale = 1.0 / math.sqrt(style_dim)
    s = style.astype(jnp.float32) @ (mod_weight.astype(jnp.float32) * mod_scale).T
    s = s + mod_bias.astype(jnp.float32)                                   # (B, Cin)
    w = (1.0 / math.sqrt(Cin * K * K)) * conv_weight.astype(jnp.float32)
    w = w * s[:, None, :, None, None]                                      # (B, Cout, Cin, K, K)
    if demodulate:
        demod = jax.lax.rsqrt(jnp.sum(w * w, axis=(2, 3, 4)) + eps)        # (B, Cout)
        w = w * demod[:, :, None, None, None]
    # (B, Cout, Cin, K, K) -> (B, K*K*Cin, Coutp), column order (kh, kw, ci), bf16.
    w_k = jnp.transpose(w, (0, 3, 4, 2, 1)).reshape(B, KKCin, Cout)
    if Coutp != Cout:
        w_k = jnp.pad(w_k, ((0, 0), (0, 0), (0, Coutp - Cout)))
    w_k = w_k.astype(jnp.bfloat16)

    # -------- input: NCHW -> padded NHWC -> flattened rows (+K-1 tail rows) --------
    x_pad = jnp.pad(jnp.transpose(x, (0, 2, 3, 1)),
                    ((0, 0), (pad, pad), (pad, pad), (0, 0))).astype(jnp.bfloat16)
    x_flat = x_pad.reshape(B, HP * WP, Cin)
    x_flat = jnp.pad(x_flat, ((0, 0), (0, K - 1), (0, 0)))   # tail halo for "wide" columns

    # -------- row-tile selection (VMEM-budget aware, generation aware) --------
    vmem_limit = _vmem_limit_bytes()
    if row_tile is not None:
        TH = int(row_tile)
    else:
        TH = _pick_row_tile(OH, WP, Cin, KKCin, Coutp, out_itemsize, vmem_limit)
    if TH >= OH or OH % TH != 0 or TH % 8 != 0:
        TH = OH                          # single tile (full dims satisfy the (8,128) rule)
    NR = OH // TH
    M_wide = TH * WP                     # "wide" output rows per tile
    M_in = (TH + K - 1) * WP + (K - 1)   # input rows per tile incl. halo

    # Overlapping row-tile slabs (K-1 row halo), materialized by the wrapper.
    if NR == 1:
        x_tiles = x_flat[:, None, :M_in, :]
    else:
        x_tiles = jnp.stack(
            [x_flat[:, r * M_wide: r * M_wide + M_in, :] for r in range(NR)], axis=1)

    # Noise * strength, flattened to the wide-row layout (lane-broadcast column).
    nz = jnp.asarray(noise_weight, jnp.float32) * noise.astype(jnp.float32).reshape(B, H, W)
    nz = jnp.pad(nz, ((0, 0), (0, 0), (0, WP - OW))).reshape(B, OH * WP, 1)

    b_vec = act_bias.astype(jnp.float32)
    if Coutp != Cout:
        b_vec = jnp.pad(b_vec, (0, Coutp - Cout))
    b_vec = b_vec.reshape(1, Coutp)

    kernel = functools.partial(_styled_conv_kernel, K=K, WP=WP, M_wide=M_wide,
                               Cin=Cin, neg_slope=negative_slope, act_scale=act_scale)

    flops = 2 * B * OH * WP * KKCin * Coutp
    bytes_accessed = (x_tiles.size * 2 + w_k.size * 2 + nz.size * 4
                      + b_vec.size * 4 + B * OH * WP * Coutp * out_itemsize)

    out_flat = pl.pallas_call(
        kernel,
        out_shape=jax.ShapeDtypeStruct((B, OH * WP, Coutp), out_dtype),
        grid_spec=pltpu.PrefetchScalarGridSpec(
            num_scalar_prefetch=0,
            grid=(B, NR),
            in_specs=[
                pl.BlockSpec((1, 1, M_in, Cin), lambda b, r: (b, r, 0, 0)),
                pl.BlockSpec((1, KKCin, Coutp), lambda b, r: (b, 0, 0)),
                pl.BlockSpec((1, M_wide, 1), lambda b, r: (b, r, 0)),
                pl.BlockSpec((1, Coutp), lambda b, r: (0, 0)),
            ],
            out_specs=pl.BlockSpec((1, M_wide, Coutp), lambda b, r: (b, r, 0)),
            scratch_shapes=[pltpu.VMEM((M_wide, KKCin), jnp.bfloat16)],
        ),
        compiler_params=pltpu.CompilerParams(
            dimension_semantics=("parallel", "parallel"),
            vmem_limit_bytes=vmem_limit,
        ),
        cost_estimate=pl.CostEstimate(
            flops=flops, transcendentals=0, bytes_accessed=bytes_accessed),
    )(x_tiles, w_k, nz, b_vec)

    # Drop the K-1 junk columns per row and any Cout padding; the slice folds
    # into the NCHW transpose (one XLA pass).  channels_last_out skips the
    # transpose when the consumer accepts NHWC.
    out = out_flat.reshape(B, OH, WP, Coutp)[:, :, :OW, :Cout]
    if channels_last_out:
        return out
    return jnp.transpose(out, (0, 3, 1, 2))


if __name__ == "__main__":
    key = jax.random.PRNGKey(0)
    k_x, k_style, k_cw, k_mw, k_noise = jax.random.split(key, 5)

    # StyledConv(in_channel=4, out_channel=8, kernel_size=3, style_dim=32)
    B, Cin, H, W = 2, 4, 16, 16
    Cout, K, style_dim = 8, 3, 32

    x = jax.random.normal(k_x, (B, Cin, H, W), jnp.float32)
    style = jax.random.normal(k_style, (B, style_dim), jnp.float32)
    conv_weight = jax.random.normal(k_cw, (1, Cout, Cin, K, K), jnp.float32)   # torch.randn
    mod_weight = jax.random.normal(k_mw, (Cin, style_dim), jnp.float32)        # EqualLinear weight
    mod_bias = jnp.ones((Cin,), jnp.float32)                                   # bias_init=1
    noise = jax.random.normal(k_noise, (B, 1, H, W), jnp.float32)              # NoiseInjection noise
    noise_weight = jnp.full((), 0.1, jnp.float32)                              # NoiseInjection.weight
    act_bias = jnp.zeros((Cout,), jnp.float32)                                 # FusedLeakyReLU.bias

    # row_tile=8 exercises the multi-tile (halo) path: grid = (B=2, NR=2).
    run = jax.jit(functools.partial(styled_conv, row_tile=8))
    out = run(x, style, conv_weight, mod_weight, mod_bias,
              noise, noise_weight, act_bias)
    out = jax.block_until_ready(out)
    assert out.shape == (B, Cout, H, W)

    # ---- pure-JAX reference mirroring the PyTorch fused ModulatedConv2d path ----
    s_ref = style @ (mod_weight * (1.0 / math.sqrt(style_dim))).T + mod_bias
    w_ref = (1.0 / math.sqrt(Cin * K * K)) * conv_weight * s_ref[:, None, :, None, None]
    demod = jax.lax.rsqrt(jnp.sum(w_ref * w_ref, axis=(2, 3, 4)) + 1e-8)
    w_ref = w_ref * demod[:, :, None, None, None]
    refs = []
    for b in range(B):
        refs.append(jax.lax.conv_general_dilated(
            x[b:b + 1], w_ref[b], window_strides=(1, 1),
            padding=((K // 2, K // 2), (K // 2, K // 2)),
            dimension_numbers=("NCHW", "OIHW", "NCHW")))
    ref = jnp.concatenate(refs, axis=0)
    ref = ref + noise_weight * noise
    ref = ref + act_bias.reshape(1, Cout, 1, 1)
    ref = jnp.where(ref >= 0.0, ref, 0.2 * ref) * math.sqrt(2.0)

    max_err = float(jnp.max(jnp.abs(out - ref)))
    assert max_err < 4e-2, f"max abs err {max_err}"

    print("KERNEL_OK")
</pallas_src>

<mosaic_0001>
module attributes {stable_mosaic.version = 11 : i64} {
  func.func @_styled_conv_kernel(%arg0: i32, %arg1: i32, %arg2: memref<1x1x182x4xbf16, #tpu.memory_space<vmem>>, %arg3: memref<1x36x8xbf16, #tpu.memory_space<vmem>>, %arg4: memref<1x144x1xf32, #tpu.memory_space<vmem>>, %arg5: memref<1x8xf32, #tpu.memory_space<vmem>>, %arg6: memref<1x144x8xf32, #tpu.memory_space<vmem>>, %arg7: memref<144x36xbf16, #tpu.memory_space<vmem>>) attributes {dimension_semantics = [#tpu.dimension_semantics<parallel>, #tpu.dimension_semantics<parallel>], iteration_bounds = array<i64: 2, 2>, scalar_prefetch = 0 : i64, scratch_operands = 1 : i64, tpu.core_type = #tpu.core_type<tc>, window_params = [{transform_indices = @transform_0, window_bounds = array<i64: 1, 1, 182, 4>}, {transform_indices = @transform_1, window_bounds = array<i64: 1, 36, 8>}, {transform_indices = @transform_2, window_bounds = array<i64: 1, 144, 1>}, {pipeline_mode = #tpu.pipeline_mode<synchronous>, transform_indices = @transform_3, window_bounds = array<i64: 1, 8>}, {transform_indices = @transform_4, window_bounds = array<i64: 1, 144, 8>}]} {
    %c0 = arith.constant 0 : index
    %c0_0 = arith.constant 0 : index
    %c0_1 = arith.constant 0 : index
    %c0_2 = arith.constant 0 : index
    %0 = vector.load %arg2[%c0, %c0_0, %c0_1, %c0_2] : memref<1x1x182x4xbf16, #tpu.memory_space<vmem>>, vector<1x1x144x4xbf16>
    %1 = vector.shape_cast %0 : vector<1x1x144x4xbf16> to vector<144x4xbf16>
    %c0_3 = arith.constant 0 : index
    %c0_4 = arith.constant 0 : index
    %2 = vector.load %arg7[%c0_3, %c0_4] : memref<144x36xbf16, #tpu.memory_space<vmem>>, vector<144x4xbf16>
    tpu.vector_store %arg7[%c0_3, %c0_4], %1 {strides = array<i32>} : memref<144x36xbf16, #tpu.memory_space<vmem>>, vector<144x4xbf16>,
    %c0_5 = arith.constant 0 : index
    %c0_6 = arith.constant 0 : index
    %c1 = arith.constant 1 : index
    %c0_7 = arith.constant 0 : index
    %3 = vector.load %arg2[%c0_5, %c0_6, %c1, %c0_7] : memref<1x1x182x4xbf16, #tpu.memory_space<vmem>>, vector<1x1x144x4xbf16>
    %4 = vector.shape_cast %3 : vector<1x1x144x4xbf16> to vector<144x4xbf16>
    %c0_8 = arith.constant 0 : index
    %c4 = arith.constant 4 : index
    %5 = vector.load %arg7[%c0_8, %c4] : memref<144x36xbf16, #tpu.memory_space<vmem>>, vector<144x4xbf16>
    tpu.vector_store %arg7[%c0_8, %c4], %4 {strides = array<i32>} : memref<144x36xbf16, #tpu.memory_space<vmem>>, vector<144x4xbf16>,
    %c0_9 = arith.constant 0 : index
    %c0_10 = arith.constant 0 : index
    %c2 = arith.constant 2 : index
    %c0_11 = arith.constant 0 : index
    %6 = vector.load %arg2[%c0_9, %c0_10, %c2, %c0_11] : memref<1x1x182x4xbf16, #tpu.memory_space<vmem>>, vector<1x1x144x4xbf16>
    %7 = vector.shape_cast %6 : vector<1x1x144x4xbf16> to vector<144x4xbf16>
    %c0_12 = arith.constant 0 : index
    %c8 = arith.constant 8 : index
    %8 = vector.load %arg7[%c0_12, %c8] : memref<144x36xbf16, #tpu.memory_space<vmem>>, vector<144x4xbf16>
    tpu.vector_store %arg7[%c0_12, %c8], %7 {strides = array<i32>} : memref<144x36xbf16, #tpu.memory_space<vmem>>, vector<144x4xbf16>,
    %c0_13 = arith.constant 0 : index
    %c0_14 = arith.constant 0 : index
    %c18 = arith.constant 18 : index
    %c0_15 = arith.constant 0 : index
    %9 = vector.load %arg2[%c0_13, %c0_14, %c18, %c0_15] : memref<1x1x182x4xbf16, #tpu.memory_space<vmem>>, vector<1x1x144x4xbf16>
    %10 = vector.shape_cast %9 : vector<1x1x144x4xbf16> to vector<144x4xbf16>
    %c0_16 = arith.constant 0 : index
    %c12 = arith.constant 12 : index
    %11 = vector.load %arg7[%c0_16, %c12] : memref<144x36xbf16, #tpu.memory_space<vmem>>, vector<144x4xbf16>
    tpu.vector_store %arg7[%c0_16, %c12], %10 {strides = array<i32>} : memref<144x36xbf16, #tpu.memory_space<vmem>>, vector<144x4xbf16>,
    %c0_17 = arith.constant 0 : index
    %c0_18 = arith.constant 0 : index
    %c19 = arith.constant 19 : index
    %c0_19 = arith.constant 0 : index
    %12 = vector.load %arg2[%c0_17, %c0_18, %c19, %c0_19] : memref<1x1x182x4xbf16, #tpu.memory_space<vmem>>, vector<1x1x144x4xbf16>
    %13 = vector.shape_cast %12 : vector<1x1x144x4xbf16> to vector<144x4xbf16>
    %c0_20 = arith.constant 0 : index
    %c16 = arith.constant 16 : index
    %14 = vector.load %arg7[%c0_20, %c16] : memref<144x36xbf16, #tpu.memory_space<vmem>>, vector<144x4xbf16>
    tpu.vector_store %arg7[%c0_20, %c16], %13 {strides = array<i32>} : memref<144x36xbf16, #tpu.memory_space<vmem>>, vector<144x4xbf16>,
    %c0_21 = arith.constant 0 : index
    %c0_22 = arith.constant 0 : index
    %c20 = arith.constant 20 : index
    %c0_23 = arith.constant 0 : index
    %15 = vector.load %arg2[%c0_21, %c0_22, %c20, %c0_23] : memref<1x1x182x4xbf16, #tpu.memory_space<vmem>>, vector<1x1x144x4xbf16>
    %16 = vector.shape_cast %15 : vector<1x1x144x4xbf16> to vector<144x4xbf16>
    %c0_24 = arith.constant 0 : index
    %c20_25 = arith.constant 20 : index
    %17 = vector.load %arg7[%c0_24, %c20_25] : memref<144x36xbf16, #tpu.memory_space<vmem>>, vector<144x4xbf16>
    tpu.vector_store %arg7[%c0_24, %c20_25], %16 {strides = array<i32>} : memref<144x36xbf16, #tpu.memory_space<vmem>>, vector<144x4xbf16>,
    %c0_26 = arith.constant 0 : index
    %c0_27 = arith.constant 0 : index
    %c36 = arith.constant 36 : index
    %c0_28 = arith.constant 0 : index
    %18 = vector.load %arg2[%c0_26, %c0_27, %c36, %c0_28] : memref<1x1x182x4xbf16, #tpu.memory_space<vmem>>, vector<1x1x144x4xbf16>
    %19 = vector.shape_cast %18 : vector<1x1x144x4xbf16> to vector<144x4xbf16>
    %c0_29 = arith.constant 0 : index
    %c24 = arith.constant 24 : index
    %20 = vector.load %arg7[%c0_29, %c24] : memref<144x36xbf16, #tpu.memory_space<vmem>>, vector<144x4xbf16>
    tpu.vector_store %arg7[%c0_29, %c24], %19 {strides = array<i32>} : memref<144x36xbf16, #tpu.memory_space<vmem>>, vector<144x4xbf16>,
    %c0_30 = arith.constant 0 : index
    %c0_31 = arith.constant 0 : index
    %c37 = arith.constant 37 : index
    %c0_32 = arith.constant 0 : index
    %21 = vector.load %arg2[%c0_30, %c0_31, %c37, %c0_32] : memref<1x1x182x4xbf16, #tpu.memory_space<vmem>>, vector<1x1x144x4xbf16>
    %22 = vector.shape_cast %21 : vector<1x1x144x4xbf16> to vector<144x4xbf16>
    %c0_33 = arith.constant 0 : index
    %c28 = arith.constant 28 : index
    %23 = vector.load %arg7[%c0_33, %c28] : memref<144x36xbf16, #tpu.memory_space<vmem>>, vector<144x4xbf16>
    tpu.vector_store %arg7[%c0_33, %c28], %22 {strides = array<i32>} : memref<144x36xbf16, #tpu.memory_space<vmem>>, vector<144x4xbf16>,
    %c0_34 = arith.constant 0 : index
    %c0_35 = arith.constant 0 : index
    %c38 = arith.constant 38 : index
    %c0_36 = arith.constant 0 : index
    %24 = vector.load %arg2[%c0_34, %c0_35, %c38, %c0_36] : memref<1x1x182x4xbf16, #tpu.memory_space<vmem>>, vector<1x1x144x4xbf16>
    %25 = vector.shape_cast %24 : vector<1x1x144x4xbf16> to vector<144x4xbf16>
    %c0_37 = arith.constant 0 : index
    %c32 = arith.constant 32 : index
    %26 = vector.load %arg7[%c0_37, %c32] : memref<144x36xbf16, #tpu.memory_space<vmem>>, vector<144x4xbf16>
    tpu.vector_store %arg7[%c0_37, %c32], %25 {strides = array<i32>} : memref<144x36xbf16, #tpu.memory_space<vmem>>, vector<144x4xbf16>,
    %c0_38 = arith.constant 0 : index
    %c0_39 = arith.constant 0 : index
    %27 = vector.load %arg7[%c0_38, %c0_39] : memref<144x36xbf16, #tpu.memory_space<vmem>>, vector<144x36xbf16>
    %c0_40 = arith.constant 0 : index
    %c0_41 = arith.constant 0 : index
    %c0_42 = arith.constant 0 : index
    %28 = vector.load %arg3[%c0_40, %c0_41, %c0_42] : memref<1x36x8xbf16, #tpu.memory_space<vmem>>, vector<1x36x8xbf16>
    %29 = vector.shape_cast %28 : vector<1x36x8xbf16> to vector<36x8xbf16>
    %cst = arith.constant dense<0.000000e+00> : vector<144x8xf32>
    %30 = tpu.matmul %27, %29, %cst {dimension_numbers = #tpu.dot_dimension_numbers<[1], [0], [0], [1], [0, 0, 1, 1], [], []>} : vector<144x36xbf16>, vector<36x8xbf16>, vector<144x8xf32> -> vector<144x8xf32>
    %c0_43 = arith.constant 0 : index
    %c0_44 = arith.constant 0 : index
    %c0_45 = arith.constant 0 : index
    %31 = vector.load %arg4[%c0_43, %c0_44, %c0_45] : memref<1x144x1xf32, #tpu.memory_space<vmem>>, vector<1x144x1xf32>
    %32 = vector.shape_cast %31 : vector<1x144x1xf32> to vector<144x1xf32>
    %33 = vector.broadcast %32 : vector<144x1xf32> to vector<144x8xf32>
    %34 = arith.addf %30, %33 : vector<144x8xf32>
    %c0_46 = arith.constant 0 : index
    %c0_47 = arith.constant 0 : index
    %35 = vector.load %arg5[%c0_46, %c0_47] : memref<1x8xf32, #tpu.memory_space<vmem>>, vector<1x8xf32>
    %36 = vector.broadcast %35 : vector<1x8xf32> to vector<144x8xf32>
    %37 = arith.addf %34, %36 : vector<144x8xf32>
    %cst_48 = arith.constant 0.000000e+00 : f32
    %38 = vector.broadcast %cst_48 : f32 to vector<144x8xf32>
    %39 = arith.cmpf oge, %37, %38 : vector<144x8xf32>
    %cst_49 = arith.constant 1.41421354 : f32
    %40 = vector.broadcast %cst_49 : f32 to vector<144x8xf32>
    %41 = arith.mulf %40, %37 : vector<144x8xf32>
    %cst_50 = arith.constant 0.282842726 : f32
    %42 = vector.broadcast %cst_50 : f32 to vector<144x8xf32>
    %43 = arith.mulf %42, %37 : vector<144x8xf32>
    %44 = arith.select %39, %41, %43 : vector<144x8xi1>, vector<144x8xf32>
    %45 = vector.shape_cast %44 : vector<144x8xf32> to vector<1x144x8xf32>
    %c0_51 = arith.constant 0 : index
    %c0_52 = arith.constant 0 : index
    %c0_53 = arith.constant 0 : index
    %46 = vector.load %arg6[%c0_51, %c0_52, %c0_53] : memref<1x144x8xf32, #tpu.memory_space<vmem>>, vector<1x144x8xf32>
    tpu.vector_store %arg6[%c0_51, %c0_52, %c0_53], %45 {strides = array<i32>} : memref<1x144x8xf32, #tpu.memory_space<vmem>>, vector<1x144x8xf32>,
    return
  }
  func.func @transform_0(%arg0: i32, %arg1: i32) -> (i32, i32, i32, i32) {
    %c0_i32 = arith.constant 0 : i32
    %c0_i32_0 = arith.constant 0 : i32
    %c0_i32_1 = arith.constant 0 : i32
    return %arg0, %arg1, %c0_i32, %c0_i32_0 : i32, i32, i32, i32
  }
  func.func @transform_1(%arg0: i32, %arg1: i32) -> (i32, i32, i32) {
    %c0_i32 = arith.constant 0 : i32
    %c0_i32_0 = arith.constant 0 : i32
    %c0_i32_1 = arith.constant 0 : i32
    return %arg0, %c0_i32, %c0_i32_0 : i32, i32, i32
  }
  func.func @transform_2(%arg0: i32, %arg1: i32) -> (i32, i32, i32) {
    %c0_i32 = arith.constant 0 : i32
    %c0_i32_0 = arith.constant 0 : i32
    return %arg0, %arg1, %c0_i32 : i32, i32, i32
  }
  func.func @transform_3(%arg0: i32, %arg1: i32) -> (i32, i32) {
    %c0_i32 = arith.constant 0 : i32
    %c0_i32_0 = arith.constant 0 : i32
    %c0_i32_1 = arith.constant 0 : i32
    return %c0_i32, %c0_i32_0 : i32, i32
  }
  func.func @transform_4(%arg0: i32, %arg1: i32) -> (i32, i32, i32) {
    %c0_i32 = arith.constant 0 : i32
    %c0_i32_0 = arith.constant 0 : i32
    return %arg0, %arg1, %c0_i32 : i32, i32, i32
  }
}

</mosaic_0001>

<bundles_post_ra>
// kernel: styled_conv.1
= control target key start
LH: loop header
LB: loop body
LE: loop exit
PB: predicated region body
PF: predicated region fallthrough
CT: control target
= control target key end

     0   :  { %s2823_s15 = smov 0   ;;  %s2825_s16 = smov 0   ;;  %s4200_s0 = inlined_call_operand.vmem [shape: bf16[2,2,182,4], index: 0, kind: input, shape index: {}]   ;;  %s4201_s1 = inlined_call_operand.vmem [shape: bf16[2,36,8], index: 1, kind: input, shape index: {}]   ;;  %s4202_s2 = inlined_call_operand.vmem [shape: f32[2,288,1], index: 2, kind: input, shape index: {}]   ;;  %s4203_s3 = inlined_call_operand.vmem [shape: f32[1,8], index: 3, kind: input, shape index: {}]   ;;  %s4204_s4 = inlined_call_operand.vmem [shape: f32[2,288,8], index: 4, kind: output, shape index: {}]  }
   0x1   :  { %s2827_s17 = smov 0   ;;  %s2829_s18 = smov 0  }
   0x2   :  { %s2831_s19 = smov 0  }
   0x3 LB: > { %s23_s20 = sadd.s32 1, %s2777_s17  ;;  %s26_s21 = sadd.s32 1, %s2781_s18  ;;  %s2785_s19 = sphi %s2831_s19, %s14_s19   ;;  %s2781_s18 = sphi %s2829_s18, %s4231_s18   ;;  %s2777_s17 = sphi %s2827_s17, %s4230_s17   ;;  %s2773_s16 = sphi %s2825_s16, %s4229_s16   ;;  %s2769_s15 = sphi %s2823_s15, %s4228_s15  }
   0x4   : > { %p24_p0 = scmp.ge.s32.totalorder %s23_s20, 2  ;;  %p2584_p1 = scmp.ge.s32.totalorder %s2785_s19, 1 }
   0x5   : > { %p209_p2 = scmp.lt.s32.totalorder %s2785_s19, 5 }
   0x6   : > { %s4233_s20 = smov (%p24_p0, %s23_s20), 0  ;;  %s4235_s21 = smov (!%p24_p0, %s26_s21), %s2781_s18 }
   0x7   : > { %p210_p3 = pnand %p2584_p1, %p209_p2  ;;  %p28_p4 = scmp.ge.s32.totalorder %s4235_s21, 2 }
   0x8   : > { %p257_p5 = scmp.lt.s32.totalorder (!%p210_p3), %s2773_s16, 1  ;;  %p259_p6 = scmp.lt.s32.totalorder (!%p210_p3), %s2769_s15, 1 }
   0x9   : > { %s4237_s21 = smov (%p28_p4, %s4235_s21), 0  ;;  %213 = sbr.rel (%p210_p3) target bundleno = 645 (0x285), region = 36 }
   0xa   : > { %s2787_s30 = smov (!%p210_p3), 4   ;;  %s2788_s5 = smov (!%p210_p3), 8  }
   0xb   : > { %s2789_s6 = smov (!%p210_p3), 12   ;;  %s2790_s7 = smov (!%p210_p3), 16  }
   0xc   : > { %s2791_s8 = smov (!%p210_p3), 20   ;;  %s2792_s9 = smov (!%p210_p3), 24  }
   0xd   : > { %s2793_s10 = smov (!%p210_p3), 28   ;;  %s2794_s11 = smov (!%p210_p3), 32  }
   0xe   : > { %s4239_s16 = smov (!%p257_p5, %s2773_s16), 1  ;;  %vm348_vm0 = vsmask.f32 3328  ;;  %vm349_vm1 = vsmask.f32 7440  ;;  %vm646_vm3 = vcmask 1042432  }
   0xf   : > { %s260_s22 = scalar_select %p259_p6, %s2769_s15, 1  ;;  %vm2874_vm2 = vmor %vm348_vm0, %vm349_vm1  ;;  %vm647_vm4 = vcmask 1046532   ;;  %vm310_vm6 = vcmask 27648   ;;  %vm962_vm7 = vsmask.f32 2304  ;;  %vm1264_vm9 = vcmask 1041408  }
  0x10   : > { %s2679_s23 = smul.u32 46, %s4239_s16  ;;  %vm2947_vm5 = vmor %vm646_vm3, %vm647_vm4  ;;  %vm963_vm8 = vsmask.f32 6416  ;;  %vm1265_vm10 = vcmask 1045508   ;;  %vm1580_vm13 = vsmask.f32 1280 }
  0x11   : > { %s2678_s24 = smul.u32 23, %s260_s22  ;;  %vm3035_vm11 = vmor %vm962_vm7, %vm963_vm8  ;;  %vm1581_vm14 = vsmask.f32 5392  ;;  %vm1882_vm0 = vcmask 1040384   ;;  %vm1883_vm1 = vcmask 1044484   ;;  %vm589_vm3 = vcmask 60448  }
  0x12   : > { %vm3053_vm12 = vmor %vm1264_vm9, %vm1265_vm10  ;;  %s2680_s12 = smul.u32 20, %s4239_s16  ;;  %vm2796_vm4 = vmmov 0   ;;  %vm924_vm7 = vcmask 126048   ;;  %vm1207_vm8 = vcmask 158848   ;;  %vm1542_vm10 = vcmask 224448  }
  0x13   : > { %s263_s25 = sadd.s32 %s2679_s23, %s2678_s24  ;;  %vm3101_vm15 = vmor %vm1580_vm13, %vm1581_vm14  ;;  %vm1825_vm13 = vcmask 257248   ;;  %vm1994_vm14 = vcmask 290048   ;;  %s271_s23 = smul.u32 18, %s2769_s15 }
  0x14   : > { %s2585_s26 = sshll.u32 %s263_s25, 2  ;;  %s3214_s22 = scalar_lea.vmem %s4201_s1, %s2680_s12 }
  0x15   : > { %s2863_s29 = scalar_lea.vmem %s4200_s0, %s2585_s26  ;;  %p3955_p7 = scmp.lt.s32.totalorder %s271_s23, 35 }
  0x16   : > { %v331_v0 = vld [vmem:[%s2863_s29 + $0x8] sm:$0xf]  ;;  %v332_v1 = vld [vmem:[%s2863_s29 + $0xc] sm:$0xf]  ;;  %v329_v2 = vld [vmem:[%s2863_s29] sm:$0xf] }
  0x17   : > { %v371_v3 = vshll.u32 %v331_v0, 16  ;;  %v375_v4 = vshrl.u32 %v331_v0, 16  ;;  %v381_v5 = vshll.u32 %v332_v1, 16  ;;  %v385_v6 = vshrl.u32 %v332_v1, 16  ;;  %v330_v7 = vld [vmem:[%s2863_s29 + $0x4] sm:$0xf] }
  0x18   : > { %v352_v8 = vshrl.u32 %v329_v2, 16  ;;  %v355_v9 = vshll.u32 %v329_v2, 16  ;;  %v361_v10 = vshll.u32 %v330_v7, 16  ;;  %v365_v11 = vshrl.u32 %v330_v7, 16  ;;  %v333_v12 = vld [vmem:[%s2863_s29 + $0x10] sm:$0xf] }
  0x19   : > { %v373_v13 = vrot.slane %v371_v3, 5  ;;  %v377_v14 = vrot.slane %v375_v4, 4  ;;  %v383_v15 = vrot.slane %v381_v5, 5  ;;  %v387_v16 = vrot.slane %v385_v6, 4  ;;  %v334_v17 = vld [vmem:[%s2863_s29 + $0x14] sm:$0xf] }
  0x1a   : > { %v354_v18 = vrot.slane %v352_v8, 4  ;;  %v357_v19 = vrot.slane %v355_v9, 5  ;;  %v363_v20 = vrot.slane %v361_v10, 5  ;;  %v367_v21 = vrot.slane %v365_v11, 4  ;;  %v335_v22 = vld [vmem:[%s2863_s29 + $0x18] sm:$0xf] }
  0x1b   : > { %v378_v23 = vor.u32 %v377_v14, %v373_v13  ;;  %v388_v24 = vor.u32 %v387_v16, %v383_v15  ;;  %v391_v25 = vshll.u32 %v333_v12, 16  ;;  %v395_v26 = vshrl.u32 %v333_v12, 16  ;;  %v336_v36 = vld [vmem:[%s2863_s29 + $0x1c] sm:$0xf]  ;;  %v337_v41 = vld [vmem:[%s2863_s29 + $0x20] sm:$0xf] }
  0x1c   : > { %v358_v28 = vor.u32 %v357_v19, %v354_v18  ;;  %v368_v29 = vor.u32 %v367_v21, %v363_v20  ;;  %v401_v30 = vshll.u32 %v334_v17, 16  ;;  %v405_v31 = vshrl.u32 %v334_v17, 16  ;;  %v338_v46 = vld [vmem:[%s2863_s29 + $0x24] sm:$0xf]  ;;  %v339_v58 = vld [vmem:[%s2863_s29 + $0x28] sm:$0xf] }
  0x1d   : > { %v379_v32 = vrot.slane %v378_v23, 4  ;;  %v389_v33 = vrot.slane %v388_v24, 4  ;;  %v393_v34 = vrot.slane %v391_v25, 5  ;;  %v411_v35 = vshll.u32 %v335_v22, 16  ;;  %v340_v0 = vld [vmem:[%s2863_s29 + $0x2c] sm:$0xf] }
  0x1e   : > { %v359_v37 = vrot.slane %v358_v28, 4  ;;  %v369_v38 = vrot.slane %v368_v29, 4  ;;  %v403_v39 = vrot.slane %v401_v30, 5  ;;  %v407_v40 = vrot.slane %v405_v31, 4  ;;  %v341_v9 = vld [vmem:[%s2863_s29 + $0x30] sm:$0xf] }
  0x1f   : > { %v384_v42 = vsel %vm2874_vm2, %v379_v32, %v383_v15  ;;  %v394_v43 = vsel %vm2874_vm2, %v389_v33, %v393_v34  ;;  %v413_v44 = vrot.slane %v411_v35, 5  ;;  %v415_v45 = vshrl.u32 %v335_v22, 16  ;;  %v342_v17 = vld [vmem:[%s2863_s29 + $0x34] sm:$0xf]  ;;  %v343_v22 = vld [vmem:[%s2863_s29 + $0x38] sm:$0xf] }
  0x20   : > { %539 = vrot.lane.b32.xlu1 %v384_v42, %s2787_s30  ;;  %v364_v47 = vsel %vm2874_vm2, %v359_v37, %v363_v20  ;;  %v374_v48 = vsel %vm2874_vm2, %v369_v38, %v373_v13  ;;  %v408_v49 = vor.u32 %v407_v40, %v403_v39  ;;  %v397_v50 = vrot.slane %v395_v26, 4  ;;  %v344_v32 = vld [vmem:[%s2863_s29 + $0x3c] sm:$0xf]  ;;  %v345_v37 = vld [vmem:[%s2863_s29 + $0x40] sm:$0xf]  ;;  %s4241_s23 = smov (!%p3955_p7, %s271_s23), 35 }
  0x21   : > { %535 = vrot.lane.b32.xlu0 %v364_v47, %s2787_s30  ;;  %v421_v51 = vshll.u32 %v336_v36, 16  ;;  %v425_v52 = vshrl.u32 %v336_v36, 16  ;;  %v431_v53 = vshll.u32 %v337_v41, 16  ;;  %v435_v54 = vshrl.u32 %v337_v41, 16  ;;  %s2681_s24 = smul.u32 36, %s4239_s16 }
  0x22   : > { %v409_v55 = vrot.slane %v408_v49, 4  ;;  %v398_v56 = vor.u32 %v397_v50, %v393_v34  ;;  %v417_v57 = vrot.slane %v415_v45, 4  ;;  %v441_v59 = vshll.u32 %v338_v46, 16  ;;  %v346_v50 = vld [vmem:[%s2863_s29 + $0x44] sm:$0xf] }
  0x23   : > { %v423_v60 = vrot.slane %v421_v51, 5  ;;  %v427_v61 = vrot.slane %v425_v52, 4  ;;  %v433_v62 = vrot.slane %v431_v53, 5  ;;  %v445_v63 = vshrl.u32 %v338_v46, 16  ;;  %s3986_s16 = sadd.s32 %s2681_s24, %s4241_s23 }
  0x24   : > { %541 = vrot.lane.b32.xlu1 %v394_v43, %s2787_s30  ;;  %v414_v1 = vsel %vm2874_vm2, %v409_v55, %v413_v44  ;;  %v399_v2 = vrot.slane %v398_v56, 4  ;;  %v418_v3 = vor.u32 %v417_v57, %v413_v44  ;;  %v443_v4 = vrot.slane %v441_v59, 5  ;;  %s2587_s25 = sshll.u32 %s3986_s16, 3 }
  0x25   : > { %537 = vrot.lane.b32.xlu0 %v374_v48, %s2787_s30  ;;  %v428_v5 = vor.u32 %v427_v61, %v423_v60  ;;  %v447_v6 = vrot.slane %v445_v63, 4  ;;  %v451_v7 = vshll.u32 %v339_v58, 16  ;;  %v455_v8 = vshrl.u32 %v339_v58, 16  ;;  %s4011_s28 = scalar_lea.vmem %s4202_s2, %s2587_s25 }
  0x26   : > { %v404_v10 = vsel %vm2874_vm2, %v399_v2, %v403_v39  ;;  %v419_v11 = vrot.slane %v418_v3, 4  ;;  %v437_v12 = vrot.slane %v435_v54, 4  ;;  %v461_v13 = vshll.u32 %v340_v0, 16 }
  0x27   : > { %v429_v14 = vrot.slane %v428_v5, 4  ;;  %v448_v15 = vor.u32 %v447_v6, %v443_v4  ;;  %v465_v16 = vshrl.u32 %v340_v0, 16  ;;  %v453_v18 = vrot.slane %v451_v7, 5 }
  0x28   : > { %545 = vrot.lane.b32.xlu1 %v414_v1, %s2787_s30  ;;  %v438_v19 = vor.u32 %v437_v12, %v433_v62  ;;  %v463_v20 = vrot.slane %v461_v13, 5  ;;  %v471_v21 = vshll.u32 %v341_v9, 16  ;;  %v475_v26 = vshrl.u32 %v341_v9, 16  ;;  %v347_v1 = vld [vmem:[%s2863_s29 + $0x48] sm:$0x1] }
  0x29   : > { %543 = vrot.lane.b32.xlu0 %v404_v10, %s2787_s30  ;;  %v434_v23 = vsel %vm2874_vm2, %v429_v14, %v433_v62  ;;  %v449_v24 = vrot.slane %v448_v15, 4  ;;  %v467_v25 = vrot.slane %v465_v16, 4  ;;  %v424_v28 = vsel %vm2874_vm2, %v419_v11, %v423_v60  ;;  %v609_v14 = vld [vmem:[%s2863_s29 + $0x4] sm:$0xf] }
  0x2a   : > { %v439_v29 = vrot.slane %v438_v19, 4  ;;  %v457_v30 = vrot.slane %v455_v8, 4  ;;  %v481_v31 = vshll.u32 %v342_v17, 16  ;;  %v473_v34 = vrot.slane %v471_v21, 5  ;;  %v610_v21 = vld [vmem:[%s2863_s29 + $0x8] sm:$0xf] }
  0x2b   : > { %v468_v33 = vor.u32 %v467_v25, %v463_v20  ;;  %v485_v35 = vshrl.u32 %v342_v17, 16  ;;  %v491_v36 = vshll.u32 %v343_v22, 16  ;;  %v454_v38 = vsel %vm2874_vm2, %v449_v24, %v453_v18 }
  0x2c   : > { %549 = vrot.lane.b32.xlu1 %v434_v23, %s2787_s30  ;;  %v444_v39 = vsel %vm2874_vm2, %v439_v29, %v443_v4  ;;  %v458_v40 = vor.u32 %v457_v30, %v453_v18  ;;  %v483_v41 = vrot.slane %v481_v31, 5  ;;  %v495_v44 = vshrl.u32 %v343_v22, 16  ;;  %v611_v22 = vld [vmem:[%s2863_s29 + $0xc] sm:$0xf]  ;;  %v608_v23 = vld [vmem:[%s2863_s29] sm:$0xe] }
  0x2d   : > { %547 = vrot.lane.b32.xlu0 %v424_v28, %s2787_s30  ;;  %v469_v42 = vrot.slane %v468_v33, 4  ;;  %v487_v43 = vrot.slane %v485_v35, 4  ;;  %v477_v45 = vrot.slane %v475_v26, 4  ;;  %v501_v47 = vshll.u32 %v344_v32, 16  ;;  %v613_v29 = vld [vmem:[%s2863_s29 + $0x14] sm:$0xf] }
  0x2e   : > { %v459_v46 = vrot.slane %v458_v40, 4  ;;  %v505_v48 = vshrl.u32 %v344_v32, 16  ;;  %v511_v49 = vshll.u32 %v345_v37, 16  ;;  %v493_v52 = vrot.slane %v491_v36, 5  ;;  %v612_v33 = vld [vmem:[%s2863_s29 + $0x10] sm:$0xf] }
  0x2f   : > { %v488_v51 = vor.u32 %v487_v43, %v483_v41  ;;  %v478_v53 = vor.u32 %v477_v45, %v473_v34  ;;  %v515_v54 = vshrl.u32 %v345_v37, 16  ;;  %v474_v55 = vsel %vm2874_vm2, %v469_v42, %v473_v34  ;;  %v614_v37 = vld [vmem:[%s2863_s29 + $0x18] sm:$0xf]  ;;  %v943_v42 = vld [vmem:[%s2863_s29 + $0x8] sm:$0xe] }
  0x30   : > { %553 = vrot.lane.b32.xlu1 %v454_v38, %s2787_s30  ;;  %v464_v56 = vsel %vm2874_vm2, %v459_v46, %v463_v20  ;;  %v503_v57 = vrot.slane %v501_v47, 5  ;;  %v507_v58 = vrot.slane %v505_v48, 4  ;;  %v513_v60 = vrot.slane %v511_v49, 5  ;;  %v615_v38 = vld [vmem:[%s2863_s29 + $0x1c] sm:$0xf] }
  0x31   : > { %551 = vrot.lane.b32.xlu0 %v444_v39, %s2787_s30  ;;  %v489_v59 = vrot.slane %v488_v51, 4  ;;  %v497_v61 = vrot.slane %v495_v44, 4  ;;  %v521_v62 = vshll.u32 %v346_v50, 16  ;;  %v479_v63 = vrot.slane %v478_v53, 4  ;;  %v2967_v47 = vld [vmem:[%s2863_s29 + $0x20] sm:$0xf] }
  0x32   : > { %v508_v0 = vor.u32 %v507_v58, %v503_v57  ;;  %v525_v2 = vshrl.u32 %v346_v50, 16  ;;  %v517_v3 = vrot.slane %v515_v54, 4  ;;  %v531_v9 = vshll.u32 %v347_v1, 16  ;;  %v2970_v48 = vld [vmem:[%s2863_s29 + $0xc] sm:$0xf] }
  0x33   : > { %v498_v4 = vor.u32 %v497_v61, %v493_v52  ;;  %v523_v5 = vrot.slane %v521_v62, 5  ;;  %v494_v7 = vsel %vm2874_vm2, %v489_v59, %v493_v52  ;;  %v484_v10 = vsel %vm2874_vm2, %v479_v63, %v483_v41  ;;  %v944_v41 = vld [vmem:[%s2863_s29 + $0xc] sm:$0xf]  ;;  %v945_v53 = vld [vmem:[%s2863_s29 + $0x10] sm:$0xf] }
  0x34   : > { %557 = vrot.lane.b32.xlu1 %v474_v55, %s2787_s30  ;;  %v527_v6 = vrot.slane %v525_v2, 4  ;;  %v509_v8 = vrot.slane %v508_v0, 4  ;;  %v518_v13 = vor.u32 %v517_v3, %v513_v60  ;;  %v533_v17 = vrot.slane %v531_v9, 5 }
  0x35   : > { %555 = vrot.lane.b32.xlu0 %v464_v56, %s2787_s30  ;;  %v499_v11 = vrot.slane %v498_v4, 4  ;;  %v651_v18 = vrot.slane %v609_v14, 5  ;;  %v654_v26 = vrot.slane %v610_v21, 5  ;;  %v657_v28 = vrot.slane %v611_v22, 5  ;;  %v3001_v14 = vld [vmem:[%s2863_s29 + $0xc] sm:$0xf] }
  0x36   : > { %v528_v12 = vor.u32 %v527_v6, %v523_v5  ;;  %v514_v15 = vsel %vm2874_vm2, %v509_v8, %v513_v60  ;;  %v519_v20 = vrot.slane %v518_v13, 4  ;;  %v2589_v32 = vrot.slane %v608_v23, 9  ;;  %v2982_v60 = vld [vmem:[%s2863_s29 + $0x10] sm:$0xf]  ;;  %v777_v6 = vld [vmem:[%s2863_s29 + $0x8] sm:$0xe] }
  0x37   : > { %v504_v19 = vsel %vm2874_vm2, %v499_v11, %v503_v57  ;;  %v653_v25 = vrot.slane %v651_v18, 4  ;;  %v663_v34 = vrot.slane %v613_v29, 5  ;;  %v659_v36 = vrot.slane %v657_v28, 4  ;;  %v3011_v21 = vld [vmem:[%s2863_s29 + $0x14] sm:$0xf] }
  0x38   : > { %561 = vrot.lane.b32.xlu1 %v494_v7, %s2787_s30  ;;  %v529_v16 = vrot.slane %v528_v12, 4  ;;  %v524_v30 = vsel %vm2874_vm2, %v519_v20, %v523_v5  ;;  %v660_v27 = vrot.slane %v612_v33, 5  ;;  %v652_v39 = vsel %vm2947_vm5, %v2589_v32, %v651_v18  ;;  %v294_v5 = vld [vmem:[%s2863_s29 + $0x8] sm:$0xf]  ;;  %v292_v7 = vld [vmem:[%s2863_s29] sm:$0xf] }
  0x39   : > { %559 = vrot.lane.b32.xlu0 %v484_v10, %s2787_s30  ;;  %v655_v35 = vsel %vm2947_vm5, %v653_v25, %v654_v26  ;;  %v656_v40 = vrot.slane %v654_v26, 4  ;;  %v665_v43 = vrot.slane %v663_v34, 4  ;;  %v666_v44 = vrot.slane %v614_v37, 5  ;;  %313 = vst.msk [vmem:[#allocation2 + $0x8] sm:$0xf] %vm310_vm6, %v294_v5 }
  0x3a   : > { %v534_v24 = vsel %vm2874_vm2, %v529_v16, %v533_v17  ;;  %v669_v45 = vrot.slane %v615_v38, 5  ;;  %v661_v46 = vsel %vm2947_vm5, %v659_v36, %v660_v27  ;;  %v975_v49 = vshrl.u32 %v944_v41, 16  ;;  %311 = vst.msk [vmem:[#allocation2] sm:$0xf] %vm310_vm6, %v292_v7  ;;  %v3006_v18 = vld [vmem:[%s2863_s29 + $0x10] sm:$0xf]  ;;  %vm3135_vm2 = vmor %vm1882_vm0, %vm1883_vm1 }
  0x3b   : > { %v978_v50 = vshll.u32 %v944_v41, 16  ;;  %v658_v51 = vsel %vm2947_vm5, %v656_v40, %v657_v28  ;;  %v662_v52 = vrot.slane %v660_v27, 4  ;;  %v966_v54 = vshrl.u32 %v943_v42, 16  ;;  %v295_v20 = vld [vmem:[%s2863_s29 + $0xc] sm:$0xf] }
  0x3c   : > { %565 = vrot.lane.b32.xlu1 %v514_v15, %s2787_s30  ;;  %v969_v55 = vshll.u32 %v943_v42, 16  ;;  %v667_v56 = vsel %vm2947_vm5, %v665_v43, %v666_v44  ;;  %v671_v57 = vrot.slane %v669_v45, 4  ;;  %v672_v58 = vrot.slane %v2967_v47, 5  ;;  %v1561_v22 = vld [vmem:[%s2863_s29 + $0x10] sm:$0xc] }
  0x3d   : > { %563 = vrot.lane.b32.xlu0 %v504_v19, %s2787_s30  ;;  %v817_v59 = vrot.slane %v2970_v48, 5  ;;  %v977_v61 = vrot.slane %v975_v49, 5  ;;  %v980_v62 = vrot.slane %v978_v50, 6  ;;  %v985_v63 = vshrl.u32 %v945_v53, 16  ;;  %v1562_v19 = vld [vmem:[%s2863_s29 + $0x14] sm:$0xf] }
  0x3e   : > { %v988_v0 = vshll.u32 %v945_v53, 16  ;;  %v664_v1 = vsel %vm2947_vm5, %v662_v52, %v663_v34  ;;  %v668_v2 = vrot.slane %v666_v44, 4  ;;  %v968_v3 = vrot.slane %v966_v54, 5  ;;  %314 = vst.msk [vmem:[#allocation2 + $0xc] sm:$0xf] %vm310_vm6, %v295_v20 }
  0x3f   : > { %v971_v4 = vrot.slane %v969_v55, 6  ;;  %v819_v8 = vrot.slane %v817_v59, 4  ;;  %v820_v9 = vrot.slane %v2982_v60, 5  ;;  %v673_v10 = vsel %vm2947_vm5, %v671_v57, %v672_v58  ;;  %v293_v23 = vld [vmem:[%s2863_s29 + $0x4] sm:$0xf] }
  0x40   : > { %569 = vrot.lane.b32.xlu1 %v534_v24, %s2787_s30  ;;  %v2998_v11 = vor.u32 %v980_v62, %v977_v61  ;;  %v987_v12 = vrot.slane %v985_v63, 5  ;;  %v990_v13 = vrot.slane %v988_v0, 6  ;;  %v670_v15 = vsel %vm2947_vm5, %v668_v2, %v669_v45  ;;  %v1563_v26 = vld [vmem:[%s2863_s29 + $0x18] sm:$0xf]  ;;  %312 = vst.msk [vmem:[#allocation2 + $0x4] sm:$0xf] %vm310_vm6, %v293_v23 }
  0x41   : > { %567 = vrot.lane.b32.xlu0 %v524_v30, %s2787_s30  ;;  %v2590_v16 = vrot.slane %v777_v6, 9  ;;  %v972_v17 = vor.u32 %v971_v4, %v968_v3  ;;  %v821_v24 = vsel %vm2947_vm5, %v819_v8, %v820_v9  ;;  %v1269_v25 = vrot.slane %v3001_v14, 6  ;;  %v297_v28 = vld [vmem:[%s2863_s29 + $0x14] sm:$0xf]  ;;  %v296_v34 = vld [vmem:[%s2863_s29 + $0x10] sm:$0xf] }
  0x42   : > { %v983_v29 = vrot.slane %v2998_v11, 4  ;;  %v3027_v30 = vor.u32 %v990_v13, %v987_v12  ;;  %v1593_v32 = vshrl.u32 %v1562_v19, 16  ;;  %v1596_v33 = vshll.u32 %v1562_v19, 16  ;;  %316 = vst.msk [vmem:[#allocation2 + $0x14] sm:$0xf] %vm310_vm6, %v297_v28 }
  0x43   : > { %v973_v27 = vrot.slane %v972_v17, 4  ;;  %v1584_v37 = vshrl.u32 %v1561_v22, 16  ;;  %v1587_v38 = vshll.u32 %v1561_v22, 16  ;;  %315 = vst.msk [vmem:[#allocation2 + $0x10] sm:$0xf] %vm310_vm6, %v296_v34  ;;  %v1271_v41 = vrot.slane %v1269_v25, 4 }
  0x44   : > { %706 = vrot.lane.b32.xlu1 %v655_v35, %s2788_s5  ;;  %v818_v35 = vsel %vm2947_vm5, %v2590_v16, %v817_v59  ;;  %v1226_v40 = vld [vmem:[%s2863_s29 + $0x8] sm:$0xc]  ;;  %v3044_v42 = vld [vmem:[%s2863_s29 + $0x18] sm:$0xf]  ;;  %v1435_v43 = vrot.slane %v3011_v21, 6  ;;  %v1603_v44 = vshrl.u32 %v1563_v26, 16 }
  0x45   : > { %704 = vrot.lane.b32.xlu0 %v652_v39, %s2788_s5  ;;  %v1272_v39 = vrot.slane %v3006_v18, 6  ;;  %v1606_v45 = vshll.u32 %v1563_v26, 16  ;;  %v1595_v49 = vrot.slane %v1593_v32, 6  ;;  %v1598_v50 = vrot.slane %v1596_v33, 7  ;;  %v298_v52 = vld [vmem:[%s2863_s29 + $0x18] sm:$0xf] }
  0x46   : > { %v982_v53 = vsel %vm3035_vm11, %v973_v27, %v2998_v11  ;;  %v2591_v54 = vrot.slane %v1226_v40, 10  ;;  %v1586_v55 = vrot.slane %v1584_v37, 6  ;;  %317 = vst.msk [vmem:[#allocation2 + $0x18] sm:$0xf] %vm310_vm6, %v298_v52  ;;  %v1395_v57 = vld [vmem:[%s2863_s29 + $0x10] sm:$0xc] }
  0x47   : > { %v1273_v59 = vsel %vm3053_vm12, %v1271_v41, %v1272_v39  ;;  %v1438_v61 = vrot.slane %v3044_v42, 6  ;;  %v301_v62 = vld [vmem:[%s2863_s29 + $0x24] sm:$0xf]  ;;  %v300_v63 = vld [vmem:[%s2863_s29 + $0x20] sm:$0xf]  ;;  %v1437_v0 = vrot.slane %v1435_v43, 4 }
  0x48   : > { %710 = vrot.lane.b32.xlu1 %v661_v46, %s2788_s5  ;;  %v992_v46 = vsel %vm3035_vm11, %v983_v29, %v3027_v30  ;;  %v1605_v2 = vrot.slane %v1603_v44, 6  ;;  %v1608_v3 = vrot.slane %v1606_v45, 7  ;;  %320 = vst.msk [vmem:[#allocation2 + $0x24] sm:$0xf] %vm310_vm6, %v301_v62  ;;  %319 = vst.msk [vmem:[#allocation2 + $0x20] sm:$0xf] %vm310_vm6, %v300_v63  ;;  %v1270_v4 = vsel %vm3053_vm12, %v2591_v54, %v1269_v25 }
  0x49   : > { %708 = vrot.lane.b32.xlu0 %v658_v51, %s2788_s5  ;;  %v299_v51 = vld [vmem:[%s2863_s29 + $0x1c] sm:$0xf]  ;;  %v2592_v5 = vrot.slane %v1395_v57, 10  ;;  %v3079_v7 = vld [vmem:[%s2863_s29 + $0x14] sm:$0xf]  ;;  %v1439_v12 = vsel %vm3053_vm12, %v1437_v0, %v1438_v61  ;;  %vm2204_vm0 = vcmask 293888  }
  0x4a   : > { %318 = vst.msk [vmem:[#allocation2 + $0x1c] sm:$0xf] %vm310_vm6, %v299_v51  ;;  %v303_v8 = vld [vmem:[%s2863_s29 + $0x2c] sm:$0xf]  ;;  %v3094_v14 = vor.u32 %v1608_v3, %v1605_v2  ;;  %v305_v16 = vld [vmem:[%s2863_s29 + $0x34] sm:$0xf] }
  0x4b   : > { %322 = vst.msk [vmem:[#allocation2 + $0x2c] sm:$0xf] %vm310_vm6, %v303_v8  ;;  %v3086_v11 = vld [vmem:[%s2863_s29 + $0x2c] sm:$0xf]  ;;  %v1436_v17 = vsel %vm3053_vm12, %v2592_v5, %v1435_v43  ;;  %v3106_v21 = vld [vmem:[%s2863_s29 + $0x18] sm:$0xf] }
  0x4c   : > { %714 = vrot.lane.b32.xlu1 %v667_v56, %s2788_s5  ;;  %v1589_v56 = vrot.slane %v1587_v38, 7  ;;  %324 = vst.msk [vmem:[#allocation2 + $0x34] sm:$0xf] %vm310_vm6, %v305_v16  ;;  %v304_v22 = vld [vmem:[%s2863_s29 + $0x30] sm:$0xf]  ;;  %v1890_v34 = vrot.slane %v3106_v21, 7 }
  0x4d   : > { %712 = vrot.lane.b32.xlu0 %v664_v1, %s2788_s5  ;;  %v1599_v1 = vor.u32 %v1598_v50, %v1595_v49  ;;  %v1844_v23 = vld [vmem:[%s2863_s29 + $0x10] sm:$0x8]  ;;  %v3113_v25 = vld [vmem:[%s2863_s29 + $0x28] sm:$0xf]  ;;  %323 = vst.msk [vmem:[#allocation2 + $0x30] sm:$0xf] %vm310_vm6, %v304_v22 }
  0x4e   : > { %v1590_v6 = vor.u32 %v1589_v56, %v1586_v55  ;;  %v3118_v26 = vld [vmem:[%s2863_s29 + $0x30] sm:$0xf]  ;;  %v3121_v28 = vld [vmem:[%s2863_s29 + $0x14] sm:$0xf]  ;;  %v307_v29 = vld [vmem:[%s2863_s29 + $0x3c] sm:$0xf] }
  0x4f   : > { %v1601_v13 = vrot.slane %v1599_v1, 4  ;;  %326 = vst.msk [vmem:[#allocation2 + $0x3c] sm:$0xf] %vm310_vm6, %v307_v29  ;;  %v2593_v38 = vrot.slane %v1844_v23, 11  ;;  %v678_v40 = vrot.slane %v3113_v25, 5  ;;  %v684_v44 = vrot.slane %v3118_v26, 5 }
  0x50   : > { %718 = vrot.lane.b32.xlu1 %v673_v10, %s2788_s5  ;;  %v302_v10 = vld [vmem:[%s2863_s29 + $0x28] sm:$0xf]  ;;  %v1591_v20 = vrot.slane %v1590_v6, 4  ;;  %v946_v41 = vld [vmem:[%s2863_s29 + $0x14] sm:$0xf]  ;;  %v822_v8 = vrot.slane %v820_v9, 4 }
  0x51   : > { %716 = vrot.lane.b32.xlu0 %v670_v15, %s2788_s5  ;;  %321 = vst.msk [vmem:[#allocation2 + $0x28] sm:$0xf] %vm310_vm6, %v302_v10  ;;  %v1887_v15 = vrot.slane %v3079_v7, 7  ;;  %v1610_v32 = vsel %vm3101_vm15, %v1601_v13, %v3094_v14  ;;  %v3144_v45 = vld [vmem:[%s2863_s29 + $0x18] sm:$0xf]  ;;  %v998_v54 = vshll.u32 %v946_v41, 16 }
  0x52   : > { %v1600_v27 = vsel %vm3101_vm15, %v1591_v20, %v1599_v1  ;;  %v788_v49 = vld [vmem:[%s2863_s29 + $0x34] sm:$0xf]  ;;  %v947_v50 = vld [vmem:[%s2863_s29 + $0x18] sm:$0xf]  ;;  %v309_v51 = vld [vmem:[%s2863_s29 + $0x44] sm:$0xf] }
  0x53   : > { %v1889_v33 = vrot.slane %v1887_v15, 4  ;;  %v954_v55 = vld [vmem:[%s2863_s29 + $0x34] sm:$0xf]  ;;  %328 = vst.msk [vmem:[#allocation2 + $0x44] sm:$0xf] %vm310_vm6, %v309_v51  ;;  %v1888_v57 = vsel %vm3135_vm2, %v2593_v38, %v1887_v15  ;;  %v826_v0 = vrot.slane %v3144_v45, 5 }
  0x54   : > { %872 = vrot.lane.b32.xlu1 %v821_v24, %s2789_s6  ;;  %v681_v24 = vrot.slane %v3086_v11, 5  ;;  %v308_v56 = vld [vmem:[%s2863_s29 + $0x40] sm:$0xf]  ;;  %v3170_v1 = vld [vmem:[%s2863_s29 + $0x30] sm:$0xf]  ;;  %v1005_v5 = vshrl.u32 %v947_v50, 16 }
  0x55   : > { %870 = vrot.lane.b32.xlu0 %v818_v35, %s2789_s6  ;;  %v306_v35 = vld [vmem:[%s2863_s29 + $0x38] sm:$0xf]  ;;  %v1891_v52 = vsel %vm3135_vm2, %v1889_v33, %v1890_v34  ;;  %327 = vst.msk [vmem:[#allocation2 + $0x40] sm:$0xf] %vm310_vm6, %v308_v56  ;;  %v953_v2 = vld [vmem:[%s2863_s29 + $0x30] sm:$0xf] }
  0x56   : > { %325 = vst.msk [vmem:[#allocation2 + $0x38] sm:$0xf] %vm310_vm6, %v306_v35  ;;  %v683_v43 = vrot.slane %v681_v24, 4  ;;  %v3175_v3 = vld [vmem:[%s2863_s29 + $0x38] sm:$0xf]  ;;  %v1008_v6 = vshll.u32 %v947_v50, 16 }
  0x57   : > { %v1075_v7 = vshrl.u32 %v954_v55, 16  ;;  %v1000_v11 = vrot.slane %v998_v54, 6  ;;  %v4208_v15 = vrot.slane %v3170_v1, 5  ;;  %v955_v16 = vld [vmem:[%s2863_s29 + $0x38] sm:$0xf]  ;;  %v1068_v20 = vshll.u32 %v953_v2, 16 }
  0x58   : > { %1155 = vrot.lane.b32.xlu1 %v992_v46, %s2790_s7  ;;  %v823_v46 = vrot.slane %v3121_v28, 5  ;;  %v685_v62 = vsel %vm2947_vm5, %v683_v43, %v684_v44  ;;  %v850_v23 = vrot.slane %v3175_v3, 5  ;;  %v1007_v9 = vrot.slane %v1005_v5, 5  ;;  %v3226_v5 = vld [vmem:[%s2863_s29 + $0x18] sm:$0xf]  ;;  %v2037_v37 = vld [vmem:[%s4011_s28 + $0x8] sm:$0xff] }
  0x59   : > { %1153 = vrot.lane.b32.xlu0 %v982_v53, %s2790_s7  ;;  %v995_v53 = vshrl.u32 %v946_v41, 16  ;;  %v1010_v28 = vrot.slane %v1008_v6, 6  ;;  %v1077_v29 = vrot.slane %v1075_v7, 5  ;;  %v1085_v33 = vshrl.u32 %v955_v16, 16  ;;  %v1237_v6 = vld [vmem:[%s2863_s29 + $0x34] sm:$0xf] }
  0x5a   : > { %v825_v63 = vrot.slane %v823_v46, 4  ;;  %v1088_v35 = vshll.u32 %v955_v16, 16  ;;  %v846_v38 = vrot.slane %v4208_v15, 4  ;;  %v1070_v43 = vrot.slane %v1068_v20, 6  ;;  %v3230_v7 = vld [vmem:[%s2863_s29 + $0x30] sm:$0xf] }
  0x5b   : > { %v997_v10 = vrot.slane %v995_v53, 5  ;;  %v3200_v50 = vor.u32 %v1010_v28, %v1007_v9  ;;  %v1564_v16 = vld [vmem:[%s2863_s29 + $0x1c] sm:$0xf]  ;;  %v1274_v20 = vrot.slane %v1272_v39, 4  ;;  %v3250_v28 = vld [vmem:[%s2863_s29 + $0x20] sm:$0xf] }
  0x5c   : > { %1324 = vrot.lane.b32.xlu1 %v1273_v59, %s2791_s8  ;;  %v680_v59 = vrot.slane %v678_v40, 4  ;;  %v827_v22 = vsel %vm2947_vm5, %v825_v63, %v826_v0  ;;  %v1090_v53 = vrot.slane %v1088_v35, 6  ;;  %v1565_v35 = vld [vmem:[%s2863_s29 + $0x20] sm:$0xf]  ;;  %v3360_v21 = vld [vmem:[%s2863_s29 + $0x1c] sm:$0xf] }
  0x5d   : > { %1322 = vrot.lane.b32.xlu0 %v1270_v4, %s2791_s8  ;;  %v847_v4 = vrot.slane %v788_v49, 5  ;;  %vm758_vm6 = vcmask 93248   ;;  %v4224_v36 = vrot.slane %v3230_v7, 6 }
  0x5e   : > { %v682_v13 = vsel %vm2947_vm5, %v680_v59, %v681_v24  ;;  %v1001_v24 = vor.u32 %v1000_v11, %v997_v10 }
  0x5f   : > { %v849_v60 = vrot.slane %v847_v4, 4  ;;  %v848_v54 = vsel %vm2947_vm5, %v846_v38, %v847_v4 }
  0x60   : > { %1490 = vrot.lane.b32.xlu1 %v1439_v12, %s2792_s9  ;;  %v1078_v12 = vshll.u32 %v954_v55, 16  ;;  %v1003_v51 = vrot.slane %v1001_v24, 4  ;;  %v993_v55 = vrot.slane %v3027_v30, 4 }
  0x61   : > { %1488 = vrot.lane.b32.xlu0 %v1436_v17, %s2792_s9  ;;  %v1065_v17 = vshrl.u32 %v953_v2, 16  ;;  %v851_v49 = vsel %vm2947_vm5, %v849_v60, %v850_v23  ;;  %v4207_v60 = vrot.slane %v3230_v7, 6 }
  0x62   : > { %v1012_v59 = vsel %vm3035_vm11, %v1003_v51, %v3200_v50  ;;  %v1002_v2 = vsel %vm3035_vm11, %v993_v55, %v1001_v24  ;;  %v1613_v24 = vshrl.u32 %v1564_v16, 16  ;;  %v1444_v51 = vrot.slane %v3250_v28, 6 }
  0x63   : > { %v1067_v41 = vrot.slane %v1065_v17, 5  ;;  %v1298_v38 = vrot.slane %v4207_v60, 4 }
  0x64   : > { %1773 = vrot.lane.b32.xlu1 %v1610_v32, %s2793_s10  ;;  %v1080_v32 = vrot.slane %v1078_v12, 6  ;;  %v1278_v12 = vrot.slane %v3226_v5, 6 }
  0x65   : > { %1771 = vrot.lane.b32.xlu0 %v1600_v27, %s2793_s10  ;;  %v824_v27 = vsel %vm2947_vm5, %v822_v8, %v823_v46  ;;  %v3207_v56 = vor.u32 %v1070_v43, %v1067_v41  ;;  %v1398_v8 = vld [vmem:[%s2863_s29 + $0x1c] sm:$0xf]  ;;  %v3265_v41 = vld [vmem:[%s2863_s29 + $0x38] sm:$0xf] }
  0x66   : > { %v1081_v46 = vor.u32 %v1080_v32, %v1077_v29  ;;  %v1441_v9 = vrot.slane %v1398_v8, 6  ;;  %v1406_v29 = vld [vmem:[%s2863_s29 + $0x3c] sm:$0xf]  ;;  %v1616_v32 = vshll.u32 %v1564_v16, 16  ;;  %v4206_v8 = vrot.slane %v3265_v41, 6 }
  0x67   : > { %v1073_v4 = vrot.slane %v3207_v56, 4  ;;  %v1572_v43 = vld [vmem:[%s2863_s29 + $0x3c] sm:$0xf] }
  0x68   : > { %1942 = vrot.lane.b32.xlu1 %v1891_v52, %s2794_s11  ;;  %v1087_v52 = vrot.slane %v1085_v33, 5  ;;  %v1618_v55 = vrot.slane %v1616_v32, 7 }
  0x69   : > { %1940 = vrot.lane.b32.xlu0 %v1888_v57, %s2794_s11  ;;  %v1229_v57 = vld [vmem:[%s2863_s29 + $0x14] sm:$0xf]  ;;  %v1082_v17 = vsel %vm3035_vm11, %v1073_v4, %v1081_v46  ;;  %v1696_v4 = vshll.u32 %v1572_v43, 16 }
  0x6a   : > { %v3220_v30 = vor.u32 %v1090_v53, %v1087_v52  ;;  %v1275_v63 = vrot.slane %v1229_v57, 6  ;;  %v1571_v52 = vld [vmem:[%s2863_s29 + $0x38] sm:$0xf]  ;;  %v3272_v53 = vld [vmem:[%s2863_s29 + $0x40] sm:$0xf]  ;;  %v1623_v57 = vshrl.u32 %v1565_v35, 16 }
  0x6b   : > { %v1686_v16 = vshll.u32 %v1571_v52, 16  ;;  %v1698_v32 = vrot.slane %v1696_v4, 7  ;;  %v1847_v4 = vld [vmem:[%s2863_s29 + $0x1c] sm:$0xf] }
  0x6c   : > { %726 = vrot.lane.b32.xlu1 %v685_v62, %s2788_s5  ;;  %v1083_v62 = vrot.slane %v1081_v46, 4  ;;  %v1277_v11 = vrot.slane %v1275_v63, 4  ;;  %v1465_v46 = vrot.slane %v1406_v29, 6  ;;  %v1625_v29 = vrot.slane %v1623_v57, 6 }
  0x6d   : > { %724 = vrot.lane.b32.xlu0 %v682_v13, %s2788_s5  ;;  %v1299_v13 = vrot.slane %v1237_v6, 6 }
  0x6e   : > { %v1092_v10 = vsel %vm3035_vm11, %v1083_v62, %v3220_v30  ;;  %v1279_v18 = vsel %vm3053_vm12, %v1277_v11, %v1278_v12  ;;  %v1683_v11 = vshrl.u32 %v1571_v52, 16  ;;  %v1467_v42 = vrot.slane %v1465_v46, 4 }
  0x6f   : > { %v1301_v39 = vrot.slane %v1299_v13, 4  ;;  %v1300_v6 = vsel %vm3053_vm12, %v1298_v38, %v1299_v13 }
  0x70   : > { %876 = vrot.lane.b32.xlu1 %v827_v22, %s2789_s6  ;;  %v3245_v22 = vld [vmem:[%s2863_s29 + $0x38] sm:$0xf]  ;;  %v1685_v38 = vrot.slane %v1683_v11, 6  ;;  %v2736_v11 = vld [vmem:[%s3214_s22 + $0x8] sm:$0xff]  }
  0x71   : > { %874 = vrot.lane.b32.xlu0 %v824_v27, %s2789_s6  ;;  %v1302_v33 = vrot.slane %v3245_v22, 6  ;;  %v1276_v27 = vsel %vm3053_vm12, %v1274_v20, %v1275_v63  ;;  %v1440_v63 = vrot.slane %v1438_v61, 4  ;;  %v1468_v20 = vrot.slane %v3272_v53, 6 }
  0x73   : > { %v1303_v62 = vsel %vm3053_vm12, %v1301_v39, %v1302_v33  ;;  %v1469_v52 = vsel %vm3053_vm12, %v1467_v42, %v1468_v20 }
  0x74   : > { %892 = vrot.lane.b32.xlu1 %v851_v49, %s2789_s6  ;;  %v1443_v49 = vrot.slane %v1441_v9, 4 }
  0x75   : > { %890 = vrot.lane.b32.xlu0 %v848_v54, %s2789_s6  ;;  %v1615_v54 = vrot.slane %v1613_v24, 6 }
  0x77   : > { %v1619_v61 = vor.u32 %v1618_v55, %v1615_v54 }
  0x78   : > { %1159 = vrot.lane.b32.xlu1 %v1012_v59, %s2790_s7  ;;  %v1626_v59 = vshll.u32 %v1565_v35, 16  ;;  %v1442_v35 = vsel %vm3053_vm12, %v1440_v63, %v1441_v9  ;;  %v1611_v63 = vrot.slane %v3094_v14, 4 }
  0x79   : > { %1157 = vrot.lane.b32.xlu0 %v1002_v2, %s2790_s7  ;;  %v1693_v2 = vshrl.u32 %v1572_v43, 16  ;;  %v1688_v43 = vrot.slane %v1686_v16, 7  ;;  %v1621_v9 = vrot.slane %v1619_v61, 4 }
  0x7a   : > { %v1628_v24 = vrot.slane %v1626_v59, 7  ;;  %v1620_v42 = vsel %vm3101_vm15, %v1611_v63, %v1619_v61 }
  0x7b   : > { %v1695_v13 = vrot.slane %v1693_v2, 6  ;;  %v3308_v2 = vor.u32 %v1688_v43, %v1685_v38 }
  0x7c   : > { %1175 = vrot.lane.b32.xlu1 %v1092_v10, %s2790_s7  ;;  %v1573_v10 = vld [vmem:[%s2863_s29 + $0x40] sm:$0xf]  ;;  %v3302_v54 = vor.u32 %v1628_v24, %v1625_v29 }
  0x7d   : > { %1173 = vrot.lane.b32.xlu0 %v1082_v17, %s2790_s7  ;;  %v1445_v17 = vsel %vm3053_vm12, %v1443_v49, %v1444_v51  ;;  %v1706_v39 = vshll.u32 %v1573_v10, 16  ;;  %v2735_v49 = vld [vmem:[%s3214_s22 + $0x10] ss:$0 sps:$4 sm:$0x33]   ;;  %v1699_v55 = vor.u32 %v1698_v32, %v1695_v13  ;;  %v1691_v29 = vrot.slane %v3308_v2, 4 }
  0x7e   : > { %v1630_v14 = vsel %vm3101_vm15, %v1621_v9, %v3302_v54  ;;  %v3327_v24 = vld [vmem:[%s2863_s29 + $0x20] sm:$0xf]  ;;  %v1855_v13 = vld [vmem:[%s2863_s29 + $0x3c] sm:$0xf]  ;;  %v3331_v32 = vld [vmem:[%s2863_s29 + $0x38] sm:$0xf] }
  0x7f   : > { %v1708_v59 = vrot.slane %v1706_v39, 7  ;;  %v1700_v43 = vsel %vm3101_vm15, %v1691_v29, %v1699_v55  ;;  %v4205_v9 = vrot.slane %v3331_v32, 7  ;;  %v829_v29 = vrot.slane %v3360_v21, 5 }
  0x80   : > { %1328 = vrot.lane.b32.xlu1 %v1279_v18, %s2791_s8  ;;  %v1703_v18 = vshrl.u32 %v1573_v10, 16  ;;  %v2234_v10 = vsel %vm1264_vm9, %v2735_v49, 0  ;;  %v1892_v49 = vrot.slane %v1890_v34, 4  ;;  %v686_v21 = vrot.slane %v684_v44, 4 }
  0x81   : > { %1326 = vrot.lane.b32.xlu0 %v1276_v27, %s2791_s8  ;;  %v1464_v27 = vrot.slane %v4206_v8, 4  ;;  %vm1376_vm9 = vcmask 191648  }
  0x82   : > { %v1705_v57 = vrot.slane %v1703_v18, 6  ;;  %v2737_v18 = vld [vmem:[%s3214_s22] sm:$0xff]  }
  0x84   : > { %1344 = vrot.lane.b32.xlu1 %v1303_v62, %s2791_s8  ;;  %v1466_v62 = vsel %vm3053_vm12, %v1464_v27, %v1465_v46  ;;  %v1701_v46 = vrot.slane %v1699_v55, 4  ;;  %v3320_v16 = vor.u32 %v1708_v59, %v1705_v57  ;;  %v1917_v27 = vrot.slane %v1855_v13, 7  ;;  %v621_v57 = vld [vmem:[%s2863_s29 + $0x34] sm:$0xf]  ;;  %v3381_v13 = vld [vmem:[%s2863_s29 + $0x20] sm:$0xf] }
  0x85   : > { %1342 = vrot.lane.b32.xlu0 %v1300_v6, %s2791_s8  ;;  %v2795_v6 = vmov 0.0   ;;  %v687_v63 = vrot.slane %v621_v57, 5 }
  0x86   : > { %2630 = vmatprep.subr.bf16.mxu0 %v2795_v6  ;;  %2672 = vmatprep.subr.bf16.mxu1 %v2795_v6  ;;  %v1710_v61 = vsel %vm3101_vm15, %v1701_v46, %v3320_v16  ;;  %v1919_v55 = vrot.slane %v1917_v27, 4  ;;  %v3374_v46 = vld [vmem:[%s2863_s29 + $0x38] sm:$0xf] }
  0x87   : > { %2631 = vmatpush3.bf16.msra.mxu0 %v2234_v10  ;;  %2675 = vmatpush3.bf16.msra.mxu1 %v2234_v10 }
  0x88   : > { %1494 = vrot.lane.b32.xlu1 %v1445_v17, %s2792_s9  ;;  %v1893_v17 = vrot.slane %v1847_v4, 7  ;;  %2632 = vmatprep.subr.bf16.mxu0 %v2795_v6  ;;  %v948_v4 = vld [vmem:[%s2863_s29 + $0x1c] sm:$0xf] }
  0x89   : > { %1492 = vrot.lane.b32.xlu0 %v1442_v35, %s2792_s9  ;;  %2673 = vmatprep.subr.bf16.mxu1 %v2795_v6  ;;  %v1896_v35 = vrot.slane %v3327_v24, 7 }
  0x8a   : > { %v1895_v39 = vrot.slane %v1893_v17, 4  ;;  %2636 = vmatprep.mubr.msk.bf16.mxu0 %vm2796_vm4, %v2795_v6  ;;  %2656 = vmatprep.mubr.msk.bf16.mxu1 %vm2796_vm4, %v2795_v6 }
  0x8b   : > { %2633 = vmatpush3.bf16.msra.mxu0 %v2736_v11  ;;  %2676 = vmatpush3.bf16.msra.mxu1 %v2736_v11  ;;  %v1894_v11 = vsel %vm3135_vm2, %v1892_v49, %v1893_v17  ;;  %v3384_v17 = vld [vmem:[%s2863_s29 + $0x3c] sm:$0xf]  ;;  %v949_v49 = vld [vmem:[%s2863_s29 + $0x20] sm:$0xf] }
  0x8c   : > { %1510 = vrot.lane.b32.xlu1 %v1469_v52, %s2792_s9  ;;  %2634 = vmatprep.subr.bf16.mxu0 %v2795_v6  ;;  %v3347_v52 = vld [vmem:[%s2863_s29 + $0x40] sm:$0xf]  ;;  %v1897_v34 = vsel %vm3135_vm2, %v1895_v39, %v1896_v35  ;;  %v1018_v39 = vshll.u32 %v948_v4, 16  ;;  %v1025_v26 = vshrl.u32 %v949_v49, 16  ;;  %v1028_v44 = vshll.u32 %v949_v49, 16 }
  0x8d   : > { %1508 = vrot.lane.b32.xlu0 %v1466_v62, %s2792_s9  ;;  %2674 = vmatprep.subr.bf16.mxu1 %v2795_v6  ;;  %v1920_v62 = vrot.slane %v3347_v52, 7 }
  0x8e   : > { %v1030_v45 = vrot.slane %v1028_v44, 6  ;;  %v1231_v44 = vld [vmem:[%s2863_s29 + $0x1c] sm:$0xf] }
  0x8f   : > { %2635 = vmatpush3.bf16.msra.mxu0 %v2737_v18  ;;  %2677 = vmatpush3.bf16.msra.mxu1 %v2737_v18  ;;  %v1921_v18 = vsel %vm3135_vm2, %v1919_v55, %v1920_v62  ;;  %v853_v55 = vrot.slane %v3384_v17, 5 }
  0x90   : > { %1777 = vrot.lane.b32.xlu1 %v1630_v14, %s2793_s10  ;;  %v1916_v14 = vrot.slane %v4205_v9, 4 }
  0x91   : > { %1775 = vrot.lane.b32.xlu0 %v1620_v42, %s2793_s10 }
  0x92   : > { %v540_v38 = vpop.permute.xlu1 %539 }
  0x93   : > { %592 = vst.msk [vmem:[#allocation2 + $0x8] sm:$0xf] %vm589_vm3, %v540_v38  ;;  %v536_v59 = vpop.permute.xlu0 %535  ;;  %v689_v38 = vrot.slane %v687_v63, 4 }
  0x94   : > { %590 = vst.msk [vmem:[#allocation2] sm:$0xf] %vm589_vm3, %v536_v59  ;;  %1793 = vrot.lane.b32.xlu1 %v1710_v61, %s2793_s10  ;;  %v1015_v61 = vshrl.u32 %v948_v4, 16  ;;  %v1918_v59 = vsel %vm3135_vm2, %v1916_v14, %v1917_v27  ;;  %v1020_v14 = vrot.slane %v1018_v39, 6 }
  0x95   : > { %1791 = vrot.lane.b32.xlu0 %v1700_v43, %s2793_s10  ;;  %v690_v43 = vrot.slane %v3374_v46, 5 }
  0x96   : > { %v542_v10 = vpop.permute.xlu1 %541  ;;  %v1017_v27 = vrot.slane %v1015_v61, 5  ;;  %v957_v61 = vld [vmem:[%s2863_s29 + $0x40] sm:$0xf] }
  0x97   : > { %593 = vst.msk [vmem:[#allocation2 + $0xc] sm:$0xf] %vm589_vm3, %v542_v10  ;;  %v538_v42 = vpop.permute.xlu0 %537  ;;  %v831_v10 = vrot.slane %v829_v29, 4  ;;  %v1108_v60 = vshll.u32 %v957_v61, 16 }
  0x98   : > { %591 = vst.msk [vmem:[#allocation2 + $0x4] sm:$0xf] %vm589_vm3, %v538_v42  ;;  %1946 = vrot.lane.b32.xlu1 %v1897_v34, %s2794_s11  ;;  %v956_v34 = vld [vmem:[%s2863_s29 + $0x3c] sm:$0xf]  ;;  %v3404_v42 = vld [vmem:[%s2863_s29 + $0x40] sm:$0xf] }
  0x99   : > { %1944 = vrot.lane.b32.xlu0 %v1894_v11, %s2794_s11  ;;  %v832_v11 = vrot.slane %v3381_v13, 5  ;;  %v1095_v9 = vshrl.u32 %v956_v34, 16  ;;  %v1098_v8 = vshll.u32 %v956_v34, 16 }
  0x9a   : > { %v546_v57 = vpop.permute.xlu1 %545 }
  0x9b   : > { %595 = vst.msk [vmem:[#allocation2 + $0x14] sm:$0xf] %vm589_vm3, %v546_v57  ;;  %v544_v4 = vpop.permute.xlu0 %543  ;;  %v691_v57 = vsel %vm2947_vm5, %v689_v38, %v690_v43  ;;  %v833_v49 = vsel %vm2947_vm5, %v831_v10, %v832_v11  ;;  %v856_v38 = vrot.slane %v3404_v42, 5  ;;  %v1100_v34 = vrot.slane %v1098_v8, 6 }
  0x9c   : > { %594 = vst.msk [vmem:[#allocation2 + $0x10] sm:$0xf] %vm589_vm3, %v544_v4  ;;  %1962 = vrot.lane.b32.xlu1 %v1921_v18, %s2794_s11  ;;  %v688_v4 = vsel %vm2947_vm5, %v686_v21, %v687_v63  ;;  %v828_v18 = vrot.slane %v826_v0, 4  ;;  %v1021_v63 = vor.u32 %v1020_v14, %v1017_v27  ;;  %v1027_v21 = vrot.slane %v1025_v26, 5 }
  0x9d   : > { %1960 = vrot.lane.b32.xlu0 %v1918_v59, %s2794_s11  ;;  %v855_v59 = vrot.slane %v853_v55, 4  ;;  %v1097_v0 = vrot.slane %v1095_v9, 5  ;;  %v1110_v27 = vrot.slane %v1108_v60, 6  ;;  %v1013_v26 = vrot.slane %v3200_v50, 4  ;;  %v1239_v50 = vld [vmem:[%s2863_s29 + $0x3c] sm:$0xf] }
  0x9e   : > { %v550_v17 = vpop.permute.xlu1 %549  ;;  %v830_v10 = vsel %vm2947_vm5, %v828_v18, %v829_v29  ;;  %v3436_v9 = vor.u32 %v1030_v45, %v1027_v21  ;;  %v1023_v29 = vrot.slane %v1021_v63, 4  ;;  %v1093_v21 = vrot.slane %v3220_v30, 4  ;;  %v3457_v45 = vld [vmem:[%s2863_s29 + $0x20] sm:$0xf] }
  0x9f   : > { %597 = vst.msk [vmem:[#allocation2 + $0x1c] sm:$0xf] %vm589_vm3, %v550_v17  ;;  %v548_v39 = vpop.permute.xlu0 %547  ;;  %v1105_v17 = vshrl.u32 %v957_v61, 16  ;;  %v857_v8 = vsel %vm2947_vm5, %v855_v59, %v856_v38  ;;  %v1101_v3 = vor.u32 %v1100_v34, %v1097_v0  ;;  %v1022_v59 = vsel %vm3035_vm11, %v1013_v26, %v1021_v63 }
  0xa0   : > { %596 = vst.msk [vmem:[#allocation2 + $0x18] sm:$0xf] %vm589_vm3, %v548_v39  ;;  %730 = vrot.lane.b32.xlu1 %v691_v57, %s2788_s5  ;;  %v852_v39 = vrot.slane %v850_v23, 4  ;;  %v1032_v60 = vsel %vm3035_vm11, %v1023_v29, %v3436_v9  ;;  %v1305_v34 = vrot.slane %v1239_v50, 6  ;;  %v1284_v30 = vrot.slane %v3457_v45, 6 }
  0xa1   : > { %728 = vrot.lane.b32.xlu0 %v688_v4, %s2788_s5  ;;  %v1107_v23 = vrot.slane %v1105_v17, 5  ;;  %v1103_v18 = vrot.slane %v1101_v3, 4  ;;  %v1280_v29 = vrot.slane %v1278_v12, 4  ;;  %v1567_v12 = vld [vmem:[%s2863_s29 + $0x28] sm:$0xf] }
  0xa2   : > { %v554_v15 = vpop.permute.xlu1 %553  ;;  %v854_v14 = vsel %vm2947_vm5, %v852_v39, %v853_v55  ;;  %v1281_v55 = vrot.slane %v1231_v44, 6  ;;  %v1400_v39 = vld [vmem:[%s2863_s29 + $0x24] sm:$0xf]  ;;  %v3705_v45 = vld [vmem:[%s2863_s29 + $0x4c] sm:$0xf] }
  0xa3   : > { %599 = vst.msk [vmem:[#allocation2 + $0x24] sm:$0xf] %vm589_vm3, %v554_v15  ;;  %v552_v57 = vpop.permute.xlu0 %551  ;;  %v3450_v61 = vor.u32 %v1110_v27, %v1107_v23  ;;  %v1566_v23 = vld [vmem:[%s2863_s29 + $0x24] sm:$0xf]  ;;  %v1447_v44 = vrot.slane %v1400_v39, 6  ;;  %v1646_v39 = vshll.u32 %v1567_v12, 16 }
  0xa4   : > { %598 = vst.msk [vmem:[#allocation2 + $0x20] sm:$0xf] %vm589_vm3, %v552_v57  ;;  %880 = vrot.lane.b32.xlu1 %v833_v49, %s2789_s6  ;;  %v1283_v17 = vrot.slane %v1281_v55, 4  ;;  %v1282_v50 = vsel %vm3053_vm12, %v1280_v29, %v1281_v55  ;;  %v3507_v55 = vld [vmem:[%s2863_s29 + $0x48] sm:$0xf] }
  0xa5   : > { %878 = vrot.lane.b32.xlu0 %v830_v10, %s2789_s6  ;;  %v1112_v63 = vsel %vm3035_vm11, %v1103_v18, %v3450_v61  ;;  %v3468_v10 = vld [vmem:[%s2863_s29 + $0x40] sm:$0xf]  ;;  %v1575_v29 = vld [vmem:[%s2863_s29 + $0x48] sm:$0xf] }
  0xa6   : > { %v558_v15 = vpop.permute.xlu1 %557  ;;  %v1308_v26 = vrot.slane %v3468_v10, 6  ;;  %v1285_v5 = vsel %vm3053_vm12, %v1283_v17, %v1284_v30  ;;  %v1643_v17 = vshrl.u32 %v1567_v12, 16  ;;  %v1474_v12 = vrot.slane %v3507_v55, 6 }
  0xa7   : > { %601 = vst.msk [vmem:[#allocation2 + $0x2c] sm:$0xf] %vm589_vm3, %v558_v15  ;;  %v556_v4 = vpop.permute.xlu0 %555  ;;  %v3478_v15 = vld [vmem:[%s2863_s29 + $0x28] sm:$0xf] }
  0xa8   : > { %600 = vst.msk [vmem:[#allocation2 + $0x28] sm:$0xf] %vm589_vm3, %v556_v4  ;;  %896 = vrot.lane.b32.xlu1 %v857_v8, %s2789_s6  ;;  %v1102_v8 = vsel %vm3035_vm11, %v1093_v21, %v1101_v3  ;;  %v3484_v4 = vld [vmem:[%s2863_s29 + $0x44] sm:$0xf]  ;;  %v1633_v3 = vshrl.u32 %v1566_v23, 16 }
  0xa9   : > { %894 = vrot.lane.b32.xlu0 %v854_v14, %s2789_s6  ;;  %v1307_v14 = vrot.slane %v1305_v34, 4 }
  0xaa   : > { %v562_v49 = vpop.permute.xlu1 %561 }
  0xab   : > { %603 = vst.msk [vmem:[#allocation2 + $0x34] sm:$0xf] %vm589_vm3, %v562_v49  ;;  %v560_v0 = vpop.permute.xlu0 %559  ;;  %v1304_v49 = vrot.slane %v1302_v33, 4  ;;  %v1309_v22 = vsel %vm3053_vm12, %v1307_v14, %v1308_v26  ;;  %v1449_v33 = vrot.slane %v1447_v44, 4 }
  0xac   : > { %602 = vst.msk [vmem:[#allocation2 + $0x30] sm:$0xf] %vm589_vm3, %v560_v0  ;;  %1163 = vrot.lane.b32.xlu1 %v1032_v60, %s2790_s7  ;;  %v1636_v60 = vshll.u32 %v1566_v23, 16  ;;  %v1450_v0 = vrot.slane %v3478_v15, 6 }
  0xad   : > { %1161 = vrot.lane.b32.xlu0 %v1022_v59, %s2790_s7  ;;  %v1574_v59 = vld [vmem:[%s2863_s29 + $0x44] sm:$0xf] }
  0xae   : > { %v566_v57 = vpop.permute.xlu1 %565  ;;  %v1713_v23 = vshrl.u32 %v1574_v59, 16 }
  0xaf   : > { %605 = vst.msk [vmem:[#allocation2 + $0x3c] sm:$0xf] %vm589_vm3, %v566_v57  ;;  %v564_v27 = vpop.permute.xlu0 %563  ;;  %v1635_v57 = vrot.slane %v1633_v3, 6  ;;  %v1451_v3 = vsel %vm3053_vm12, %v1449_v33, %v1450_v0 }
  0xb0   : > { %604 = vst.msk [vmem:[#allocation2 + $0x38] sm:$0xf] %vm589_vm3, %v564_v27  ;;  %1179 = vrot.lane.b32.xlu1 %v1112_v63, %s2790_s7  ;;  %v1471_v63 = vrot.slane %v3484_v4, 6  ;;  %v1716_v27 = vshll.u32 %v1574_v59, 16  ;;  %v1726_v59 = vshll.u32 %v1575_v29, 16 }
  0xb1   : > { %1177 = vrot.lane.b32.xlu0 %v1102_v8, %s2790_s7  ;;  %v1638_v8 = vrot.slane %v1636_v60, 7  ;;  %v1645_v60 = vrot.slane %v1643_v17, 6 }
  0xb2   : > { %v570_v18 = vpop.permute.xlu1 %569 }
  0xb3   : > { %607 = vst.msk [vmem:[#allocation2 + $0x44] sm:$0xf] %vm589_vm3, %v570_v18  ;;  %v568_v21 = vpop.permute.xlu0 %567  ;;  %v1446_v18 = vrot.slane %v1444_v51, 4  ;;  %v1639_v28 = vor.u32 %v1638_v8, %v1635_v57  ;;  %v1715_v51 = vrot.slane %v1713_v23, 6  ;;  %v1631_v23 = vrot.slane %v3302_v54, 4 }
  0xb4   : > { %606 = vst.msk [vmem:[#allocation2 + $0x40] sm:$0xf] %vm589_vm3, %v568_v21  ;;  %1332 = vrot.lane.b32.xlu1 %v1285_v5, %s2791_s8  ;;  %v1306_v5 = vsel %vm3053_vm12, %v1304_v49, %v1305_v34  ;;  %v1473_v21 = vrot.slane %v1471_v63, 4  ;;  %v1648_v34 = vrot.slane %v1646_v39, 7  ;;  %v1718_v49 = vrot.slane %v1716_v27, 7 }
  0xb5   : > { %1330 = vrot.lane.b32.xlu0 %v1282_v50, %s2791_s8  ;;  %v1723_v50 = vshrl.u32 %v1575_v29, 16  ;;  %v1849_v27 = vld [vmem:[%s2863_s29 + $0x24] sm:$0xf] }
  0xb6   : > { %v707_v4 = vpop.permute.xlu1 %706  ;;  %v1475_v17 = vsel %vm3053_vm12, %v1473_v21, %v1474_v12  ;;  %v3535_v39 = vor.u32 %v1648_v34, %v1645_v60  ;;  %v1719_v53 = vor.u32 %v1718_v49, %v1715_v51  ;;  %v1640_v34 = vsel %vm3101_vm15, %v1631_v23, %v1639_v28  ;;  %v3555_v51 = vld [vmem:[%s2863_s29 + $0x28] sm:$0xf]  ;;  %v1857_v49 = vld [vmem:[%s2863_s29 + $0x44] sm:$0xf] }
  0xb7   : > { %760 = vst.msk [vmem:[#allocation2 + $0x4] sm:$0xf] %vm758_vm6, %v707_v4  ;;  %v705_v14 = vpop.permute.xlu0 %704  ;;  %v1725_v57 = vrot.slane %v1723_v50, 6  ;;  %v1711_v50 = vrot.slane %v3320_v16, 4  ;;  %v950_v23 = vld [vmem:[%s2863_s29 + $0x24] sm:$0xf] }
  0xb8   : > { %759 = vst.msk [vmem:[#allocation2] sm:$0xf] %vm758_vm6, %v705_v14  ;;  %1348 = vrot.lane.b32.xlu1 %v1309_v22, %s2791_s8  ;;  %v1448_v14 = vsel %vm3053_vm12, %v1446_v18, %v1447_v44  ;;  %v1470_v22 = vrot.slane %v1468_v20, 4  ;;  %v1641_v44 = vrot.slane %v1639_v28, 4  ;;  %v1728_v20 = vrot.slane %v1726_v59, 7 }
  0xb9   : > { %1346 = vrot.lane.b32.xlu0 %v1306_v5, %s2791_s8  ;;  %v2797_v18 = vmov 0   ;;  %v1721_v21 = vrot.slane %v1719_v53, 4  ;;  %v1035_v52 = vshrl.u32 %v950_v23, 16 }
  0xba   : > { %v711_v4 = vpop.permute.xlu1 %710  ;;  %v1472_v29 = vsel %vm3053_vm12, %v1470_v22, %v1471_v63  ;;  %2733 = vset.pattern.permute.xlu0 %v2797_v18  ;;  %v1650_v63 = vsel %vm3101_vm15, %v1641_v44, %v3535_v39  ;;  %v3549_v54 = vor.u32 %v1728_v20, %v1725_v57  ;;  %2734 = vset.pattern.permute.xlu1 %v2797_v18  ;;  %v3571_v44 = vld [vmem:[%s2863_s29 + $0x48] sm:$0xf]  ;;  %v623_v57 = vld [vmem:[%s2863_s29 + $0x3c] sm:$0xf]  ;;  %v1922_v18 = vrot.slane %v1920_v62, 4 }
  0xbb   : > { %762 = vst.msk [vmem:[#allocation2 + $0xc] sm:$0xf] %vm758_vm6, %v711_v4  ;;  %v709_v33 = vpop.permute.xlu0 %708  ;;  %v1902_v4 = vrot.slane %v3555_v51, 7  ;;  %v1038_v62 = vshll.u32 %v950_v23, 16 }
  0xbc   : > { %761 = vst.msk [vmem:[#allocation2 + $0x8] sm:$0xf] %vm758_vm6, %v709_v33  ;;  %1498 = vrot.lane.b32.xlu1 %v1451_v3, %s2792_s9  ;;  %v1899_v3 = vrot.slane %v1849_v27, 7  ;;  %v1730_v16 = vsel %vm3101_vm15, %v1721_v21, %v3549_v54  ;;  %v1720_v33 = vsel %vm3101_vm15, %v1711_v50, %v1719_v53  ;;  %v1926_v53 = vrot.slane %v3571_v44, 7  ;;  %v786_v44 = vld [vmem:[%s2863_s29 + $0x2c] sm:$0xf] }
  0xbd   : > { %1496 = vrot.lane.b32.xlu0 %v1448_v14, %s2792_s9  ;;  %v1923_v14 = vrot.slane %v1857_v49, 7  ;;  %v1040_v46 = vrot.slane %v1038_v62, 6 }
  0xbe   : > { %v715_v8 = vpop.permute.xlu1 %714  ;;  %v1901_v28 = vrot.slane %v1899_v3, 4 }
  0xbf   : > { %764 = vst.msk [vmem:[#allocation2 + $0x14] sm:$0xf] %vm758_vm6, %v715_v8  ;;  %v713_v5 = vpop.permute.xlu0 %712  ;;  %v3578_v8 = vld [vmem:[%s2863_s29 + $0x24] sm:$0xf] }
  0xc0   : > { %763 = vst.msk [vmem:[#allocation2 + $0x10] sm:$0xf] %vm758_vm6, %v713_v5  ;;  %1514 = vrot.lane.b32.xlu1 %v1475_v17, %s2792_s9  ;;  %v1898_v17 = vrot.slane %v1896_v35, 4  ;;  %v1903_v24 = vsel %vm3135_vm2, %v1901_v28, %v1902_v4  ;;  %v1925_v35 = vrot.slane %v1923_v14, 4 }
  0xc1   : > { %1512 = vrot.lane.b32.xlu0 %v1472_v29, %s2792_s9  ;;  %v693_v29 = vrot.slane %v623_v57, 5 }
  0xc2   : > { %v719_v60 = vpop.permute.xlu1 %718  ;;  %v1900_v5 = vsel %vm3135_vm2, %v1898_v17, %v1899_v3  ;;  %v3602_v3 = vld [vmem:[%s2863_s29 + $0x44] sm:$0xf]  ;;  %v1927_v50 = vsel %vm3135_vm2, %v1925_v35, %v1926_v53  ;;  %v3622_v35 = vld [vmem:[%s2863_s29 + $0x48] sm:$0xf] }
  0xc3   : > { %766 = vst.msk [vmem:[#allocation2 + $0x1c] sm:$0xf] %vm758_vm6, %v719_v60  ;;  %v717_v59 = vpop.permute.xlu0 %716  ;;  %v3596_v60 = vld [vmem:[%s2863_s29 + $0x28] sm:$0xf]  ;;  %v695_v49 = vrot.slane %v693_v29, 4 }
  0xc4   : > { %765 = vst.msk [vmem:[#allocation2 + $0x18] sm:$0xf] %vm758_vm6, %v717_v59  ;;  %1781 = vrot.lane.b32.xlu1 %v1650_v63, %s2793_s10  ;;  %v3592_v63 = vld [vmem:[%s2863_s29 + $0x40] sm:$0xf]  ;;  %v958_v17 = vld [vmem:[%s2863_s29 + $0x44] sm:$0xf] }
  0xc5   : > { %1779 = vrot.lane.b32.xlu0 %v1640_v34, %s2793_s10  ;;  %v835_v34 = vrot.slane %v3578_v8, 5  ;;  %v696_v59 = vrot.slane %v3592_v63, 5  ;;  %v4209_v8 = vrot.slane %v3596_v60, 5  ;;  %v961_v63 = vld [vmem:[%s2863_s29 + $0x50] sm:$0x3] }
  0xc6   : > { %v873_v22 = vpop.permute.xlu1 %872 }
  0xc7   : > { %926 = vst.msk [vmem:[#allocation2 + $0x4] sm:$0xf] %vm924_vm7, %v873_v22  ;;  %v871_v20 = vpop.permute.xlu0 %870  ;;  %v1924_v22 = vsel %vm3135_vm2, %v1922_v18, %v1923_v14  ;;  %v1037_v14 = vrot.slane %v1035_v52, 5  ;;  %v1118_v18 = vshll.u32 %v958_v17, 16  ;;  %v959_v52 = vld [vmem:[%s2863_s29 + $0x48] sm:$0xf] }
  0xc8   : > { %925 = vst.msk [vmem:[#allocation2] sm:$0xf] %vm924_vm7, %v871_v20  ;;  %1797 = vrot.lane.b32.xlu1 %v1730_v16, %s2793_s10  ;;  %v951_v16 = vld [vmem:[%s2863_s29 + $0x28] sm:$0xf]  ;;  %v837_v20 = vrot.slane %v835_v34, 4 }
  0xc9   : > { %1795 = vrot.lane.b32.xlu0 %v1720_v33, %s2793_s10  ;;  %v692_v33 = vrot.slane %v690_v43, 4  ;;  %v1045_v43 = vshrl.u32 %v951_v16, 16  ;;  %v1048_v23 = vshll.u32 %v951_v16, 16 }
  0xca   : > { %v1156_v27 = vpop.permute.xlu1 %1155  ;;  %v839_v16 = vsel %vm2947_vm5, %v837_v20, %v4209_v8  ;;  %v858_v8 = vrot.slane %v856_v38, 4 }
  0xcb   : > { %1209 = vst.msk [vmem:[#allocation2 + $0x4] sm:$0xf] %vm1207_vm8, %v1156_v27  ;;  %v1154_v21 = vpop.permute.xlu0 %1153  ;;  %v697_v27 = vsel %vm2947_vm5, %v695_v49, %v696_v59  ;;  %v862_v49 = vrot.slane %v3622_v35, 5  ;;  %v1047_v13 = vrot.slane %v1045_v43, 5 }
  0xcc   : > { %1208 = vst.msk [vmem:[#allocation2] sm:$0xf] %vm1207_vm8, %v1154_v21  ;;  %1950 = vrot.lane.b32.xlu1 %v1903_v24, %s2794_s11  ;;  %v859_v24 = vrot.slane %v3602_v3, 5  ;;  %v694_v3 = vsel %vm2947_vm5, %v692_v33, %v693_v29  ;;  %v1120_v33 = vrot.slane %v1118_v18, 6  ;;  %v1033_v18 = vrot.slane %v3436_v9, 4 }
  0xcd   : > { %1948 = vrot.lane.b32.xlu0 %v1900_v5, %s2794_s11  ;;  %v1115_v5 = vshrl.u32 %v958_v17, 16  ;;  %v1125_v17 = vshrl.u32 %v959_v52, 16  ;;  %v1241_v9 = vld [vmem:[%s2863_s29 + $0x44] sm:$0xf] }
  0xce   : > { %v1325_v28 = vpop.permute.xlu1 %1324  ;;  %v861_v29 = vrot.slane %v859_v24, 4 }
  0xcf   : > { %1378 = vst.msk [vmem:[#allocation2 + $0x4] sm:$0xf] %vm1376_vm9, %v1325_v28  ;;  %v1323_v57 = vpop.permute.xlu0 %1322  ;;  %v1041_v28 = vor.u32 %v1040_v46, %v1037_v14 }
  0xd0   : > { %1377 = vst.msk [vmem:[#allocation2] sm:$0xf] %vm1376_vm9, %v1323_v57  ;;  %1966 = vrot.lane.b32.xlu1 %v1927_v50, %s2794_s11  ;;  %v834_v50 = vrot.slane %v832_v11, 4  ;;  %v1050_v11 = vrot.slane %v1048_v23, 6  ;;  %v1128_v57 = vshll.u32 %v959_v52, 16  ;;  %v863_v14 = vsel %vm2947_vm5, %v861_v29, %v862_v49 }
  0xd1   : > { %1964 = vrot.lane.b32.xlu0 %v1924_v22, %s2794_s11  ;;  %v1117_v22 = vrot.slane %v1115_v5, 5  ;;  %v1043_v42 = vrot.slane %v1041_v28, 4  ;;  %v860_v5 = vsel %vm2947_vm5, %v858_v8, %v859_v24  ;;  %v1042_v29 = vsel %vm3035_vm11, %v1033_v18, %v1041_v28 }
  0xd2   : > { %v1491_v21 = vpop.permute.xlu1 %1490  ;;  %v836_v20 = vsel %vm2947_vm5, %v834_v50, %v835_v34  ;;  %v3654_v46 = vor.u32 %v1050_v11, %v1047_v13  ;;  %v1127_v34 = vrot.slane %v1125_v17, 5  ;;  %v1130_v43 = vrot.slane %v1128_v57, 6  ;;  %v3675_v11 = vld [vmem:[%s2863_s29 + $0x28] sm:$0xf] }
  0xd3   : > { %1544 = vst.msk [vmem:[#allocation2 + $0x4] sm:$0xf] %vm1542_vm10, %v1491_v21  ;;  %v1489_v62 = vpop.permute.xlu0 %1488  ;;  %v1121_v38 = vor.u32 %v1120_v33, %v1117_v22  ;;  %v1113_v13 = vrot.slane %v3450_v61, 4  ;;  %v1311_v33 = vrot.slane %v1241_v9, 6  ;;  %v1290_v61 = vrot.slane %v3675_v11, 6 }
  0xd4   : > { %1543 = vst.msk [vmem:[#allocation2] sm:$0xf] %vm1542_vm10, %v1489_v62  ;;  %734 = vrot.lane.b32.xlu1 %v697_v27, %s2788_s5  ;;  %v1052_v52 = vsel %vm3035_vm11, %v1043_v42, %v3654_v46  ;;  %v3686_v57 = vld [vmem:[%s2863_s29 + $0x48] sm:$0xf]  ;;  %v1568_v42 = vld [vmem:[%s2863_s29 + $0x2c] sm:$0xf] }
  0xd5   : > { %732 = vrot.lane.b32.xlu0 %v694_v3, %s2788_s5  ;;  %v1233_v3 = vld [vmem:[%s2863_s29 + $0x24] sm:$0xf]  ;;  %v1123_v62 = vrot.slane %v1121_v38, 4 }
  0xd6   : > { %v1774_v21 = vpop.permute.xlu1 %1773  ;;  %v1287_v8 = vrot.slane %v1233_v3, 6  ;;  %v1569_v3 = vld [vmem:[%s2863_s29 + $0x30] sm:$0xf] }
  0xd7   : > { %1827 = vst.msk [vmem:[#allocation2 + $0x4] sm:$0xf] %vm1825_vm13, %v1774_v21  ;;  %v1772_v27 = vpop.permute.xlu0 %1771  ;;  %v3689_v21 = vld [vmem:[%s2863_s29 + $0x2c] sm:$0xf] }
  0xd8   : > { %1826 = vst.msk [vmem:[#allocation2] sm:$0xf] %vm1825_vm13, %v1772_v27  ;;  %884 = vrot.lane.b32.xlu1 %v839_v16, %s2789_s6  ;;  %v3668_v16 = vor.u32 %v1130_v43, %v1127_v34  ;;  %v1289_v17 = vrot.slane %v1287_v8, 4  ;;  %v1122_v27 = vsel %vm3035_vm11, %v1113_v13, %v1121_v38  ;;  %v1314_v38 = vrot.slane %v3686_v57, 6 }
  0xd9   : > { %882 = vrot.lane.b32.xlu0 %v836_v20, %s2789_s6  ;;  %v1453_v18 = vrot.slane %v3689_v21, 6  ;;  %v1666_v21 = vshll.u32 %v1569_v3, 16 }
  0xda   : > { %v1943_v23 = vpop.permute.xlu1 %1942  ;;  %v1132_v28 = vsel %vm3035_vm11, %v1123_v62, %v3668_v16 }
  0xdb   : > { %1996 = vst.msk [vmem:[#allocation2 + $0x4] sm:$0xf] %vm1994_vm14, %v1943_v23  ;;  %v1941_v50 = vpop.permute.xlu0 %1940  ;;  %v3698_v23 = vld [vmem:[%s2863_s29 + $0x30] sm:$0xf] }
  0xdc   : > { %1995 = vst.msk [vmem:[#allocation2] sm:$0xf] %vm1994_vm14, %v1941_v50  ;;  %900 = vrot.lane.b32.xlu1 %v863_v14, %s2789_s6  ;;  %v1286_v14 = vrot.slane %v1284_v30, 4  ;;  %v1291_v30 = vsel %vm3053_vm12, %v1289_v17, %v1290_v61  ;;  %v1653_v50 = vshrl.u32 %v1568_v42, 16  ;;  %v1663_v17 = vshrl.u32 %v1569_v3, 16 }
  0xdd   : > { %898 = vrot.lane.b32.xlu0 %v860_v5, %s2789_s6  ;;  %v1313_v5 = vrot.slane %v1311_v33, 4 }
  0xde   : > { %v727_v24 = vpop.permute.xlu1 %726  ;;  %v1288_v9 = vsel %vm3053_vm12, %v1286_v14, %v1287_v8  ;;  %v3731_v8 = vld [vmem:[%s2863_s29 + $0x50] sm:$0xf] }
  0xdf   : > { %770 = vst.msk [vmem:[#allocation2 + $0x2c] sm:$0xf] %vm758_vm6, %v727_v24  ;;  %v725_v22 = vpop.permute.xlu0 %724  ;;  %v1310_v24 = vrot.slane %v1308_v26, 4  ;;  %v1315_v10 = vsel %vm3053_vm12, %v1313_v5, %v1314_v38  ;;  %v1455_v26 = vrot.slane %v1453_v18, 4  ;;  %v1577_v14 = vld [vmem:[%s2863_s29 + $0x50] sm:$0xf] }
  0xe0   : > { %769 = vst.msk [vmem:[#allocation2 + $0x28] sm:$0xf] %vm758_vm6, %v725_v22  ;;  %1167 = vrot.lane.b32.xlu1 %v1052_v52, %s2790_s7  ;;  %v1656_v52 = vshll.u32 %v1568_v42, 16  ;;  %v1456_v22 = vrot.slane %v3698_v23, 6  ;;  %v1480_v3 = vrot.slane %v3731_v8, 6 }
  0xe1   : > { %1165 = vrot.lane.b32.xlu0 %v1042_v29, %s2790_s7  ;;  %v1576_v29 = vld [vmem:[%s2863_s29 + $0x4c] sm:$0xf] }
  0xe2   : > { %v877_v20 = vpop.permute.xlu1 %876  ;;  %v1733_v42 = vshrl.u32 %v1576_v29, 16 }
  0xe3   : > { %928 = vst.msk [vmem:[#allocation2 + $0xc] sm:$0xf] %vm924_vm7, %v877_v20  ;;  %v875_v34 = vpop.permute.xlu0 %874  ;;  %v2738_v43 = vld [vmem:[#allocation2] sm:$0xff]   ;;  %v1655_v20 = vrot.slane %v1653_v50, 6  ;;  %v1457_v50 = vsel %vm3053_vm12, %v1455_v26, %v1456_v22 }
  0xe4   : > { %927 = vst.msk [vmem:[#allocation2 + $0x8] sm:$0xf] %vm924_vm7, %v875_v34  ;;  %1183 = vrot.lane.b32.xlu1 %v1132_v28, %s2790_s7  ;;  %2637 = vmatmul.mubr.msk.bf16.vlgmr.msra.gmra.mxu0 %vm2204_vm0, %v2738_v43  ;;  %v1477_v28 = vrot.slane %v3705_v45, 6  ;;  %v1736_v34 = vshll.u32 %v1576_v29, 16  ;;  %v1312_v45 = vsel %vm3053_vm12, %v1310_v24, %v1311_v33  ;;  %v1668_v33 = vrot.slane %v1666_v21, 7 }
  0xe5   : > { %1181 = vrot.lane.b32.xlu0 %v1122_v27, %s2790_s7  ;;  %2640 = vmatprep.mubr.msk.bf16.mxu0 %vm2796_vm4, %v2795_v6  ;;  %v1658_v27 = vrot.slane %v1656_v52, 7  ;;  %v1665_v52 = vrot.slane %v1663_v17, 6  ;;  %v1746_v29 = vshll.u32 %v1577_v14, 16 }
  0xe6   : > { %v893_v62 = vpop.permute.xlu1 %892  ;;  %v1738_v24 = vrot.slane %v1736_v34, 7  ;;  %v1851_v34 = vld [vmem:[%s2863_s29 + $0x2c] sm:$0xf] }
  0xe7   : > { %936 = vst.msk [vmem:[#allocation2 + $0x2c] sm:$0xf] %vm924_vm7, %v893_v62  ;;  %v891_v13 = vpop.permute.xlu0 %890  ;;  %v1479_v62 = vrot.slane %v1477_v28, 4  ;;  %v1659_v15 = vor.u32 %v1658_v27, %v1655_v20  ;;  %v3759_v21 = vor.u32 %v1668_v33, %v1665_v52  ;;  %v1731_v52 = vrot.slane %v3549_v54, 4  ;;  %v3779_v33 = vld [vmem:[%s2863_s29 + $0x30] sm:$0xf] }
  0xe8   : > { %935 = vst.msk [vmem:[#allocation2 + $0x28] sm:$0xf] %vm924_vm7, %v891_v13  ;;  %1336 = vrot.lane.b32.xlu1 %v1291_v30, %s2791_s8  ;;  %v1452_v30 = vrot.slane %v1450_v0, 4  ;;  %v1735_v0 = vrot.slane %v1733_v42, 6  ;;  %v1651_v42 = vrot.slane %v3535_v39, 4  ;;  %v1908_v54 = vrot.slane %v3779_v33, 7 }
  0xe9   : > { %1334 = vrot.lane.b32.xlu0 %v1288_v9, %s2791_s8  ;;  %v1743_v9 = vshrl.u32 %v1577_v14, 16  ;;  %v1481_v17 = vsel %vm3053_vm12, %v1479_v62, %v1480_v3 }
  0xea   : > { %v1160_v43 = vpop.permute.xlu1 %1159  ;;  %v1739_v55 = vor.u32 %v1738_v24, %v1735_v0  ;;  %v1660_v39 = vsel %vm3101_vm15, %v1651_v42, %v1659_v15  ;;  %v1928_v42 = vrot.slane %v1926_v53, 4 }
  0xeb   : > { %1211 = vst.msk [vmem:[#allocation2 + $0xc] sm:$0xf] %vm1207_vm8, %v1160_v43  ;;  %v1158_v5 = vpop.permute.xlu0 %1157  ;;  %v1454_v43 = vsel %vm3053_vm12, %v1452_v30, %v1453_v18  ;;  %v1661_v18 = vrot.slane %v1659_v15, 4  ;;  %v1745_v20 = vrot.slane %v1743_v9, 6  ;;  %v1859_v9 = vld [vmem:[%s2863_s29 + $0x4c] sm:$0xf] }
  0xec   : > { %1210 = vst.msk [vmem:[#allocation2 + $0x8] sm:$0xf] %vm1207_vm8, %v1158_v5  ;;  %1352 = vrot.lane.b32.xlu1 %v1315_v10, %s2791_s8  ;;  %v1476_v10 = vrot.slane %v1474_v12, 4  ;;  %v1748_v12 = vrot.slane %v1746_v29, 7  ;;  %v1741_v5 = vrot.slane %v1739_v55, 4  ;;  %v1929_v29 = vrot.slane %v1859_v9, 7 }
  0xed   : > { %1350 = vrot.lane.b32.xlu0 %v1312_v45, %s2791_s8  ;;  %v1670_v30 = vsel %vm3101_vm15, %v1661_v18, %v3759_v21 }
  0xee   : > { %v1176_v13 = vpop.permute.xlu1 %1175  ;;  %v1478_v14 = vsel %vm3053_vm12, %v1476_v10, %v1477_v28  ;;  %v3773_v62 = vor.u32 %v1748_v12, %v1745_v20  ;;  %v1905_v28 = vrot.slane %v1851_v34, 7  ;;  %v1904_v10 = vrot.slane %v1902_v4, 4  ;;  %v625_v12 = vld [vmem:[%s2863_s29 + $0x44] sm:$0xf] }
  0xef   : > { %1219 = vst.msk [vmem:[#allocation2 + $0x2c] sm:$0xf] %vm1207_vm8, %v1176_v13  ;;  %v1174_v26 = vpop.permute.xlu0 %1173  ;;  %v1931_v51 = vrot.slane %v1929_v29, 4 }
  0xf0   : > { %1218 = vst.msk [vmem:[#allocation2 + $0x28] sm:$0xf] %vm1207_vm8, %v1174_v26  ;;  %1502 = vrot.lane.b32.xlu1 %v1457_v50, %s2792_s9  ;;  %v1750_v15 = vsel %vm3101_vm15, %v1741_v5, %v3773_v62  ;;  %v1907_v24 = vrot.slane %v1905_v28, 4  ;;  %v3795_v26 = vld [vmem:[%s2863_s29 + $0x50] sm:$0xf] }
  0xf1   : > { %1500 = vrot.lane.b32.xlu0 %v1454_v43, %s2792_s9  ;;  %v1740_v43 = vsel %vm3101_vm15, %v1731_v52, %v1739_v55  ;;  %v1932_v4 = vrot.slane %v3795_v26, 7  ;;  %v952_v52 = vld [vmem:[%s2863_s29 + $0x2c] sm:$0xf] }
  0xf2   : > { %v1329_v27 = vpop.permute.xlu1 %1328  ;;  %v1909_v55 = vsel %vm3135_vm2, %v1907_v24, %v1908_v54  ;;  %v841_v24 = vrot.slane %v786_v44, 5  ;;  %v4223_v44 = vrot.slane %v3170_v1, 5  ;;  %v864_v1 = vrot.slane %v862_v49, 4 }
  0xf3   : > { %1380 = vst.msk [vmem:[#allocation2 + $0xc] sm:$0xf] %vm1376_vm9, %v1329_v27  ;;  %v1327_v45 = vpop.permute.xlu0 %1326  ;;  %v1053_v49 = vrot.slane %v3654_v46, 4 }
  0xf4   : > { %1379 = vst.msk [vmem:[#allocation2 + $0x8] sm:$0xf] %vm1376_vm9, %v1327_v45  ;;  %1518 = vrot.lane.b32.xlu1 %v1481_v17, %s2792_s9  ;;  %v617_v17 = vld [vmem:[%s2863_s29 + $0x24] sm:$0xf]  ;;  %v699_v45 = vrot.slane %v625_v12, 5 }
  0xf5   : > { %1516 = vrot.lane.b32.xlu0 %v1478_v14, %s2792_s9  ;;  %v675_v20 = vrot.slane %v617_v17, 5  ;;  %v1906_v14 = vsel %vm3135_vm2, %v1904_v10, %v1905_v28  ;;  %v626_v28 = vld [vmem:[%s2863_s29 + $0x48] sm:$0x1]  ;;  %v698_v17 = vrot.slane %v696_v59, 4 }
  0xf6   : > { %v1345_v50 = vpop.permute.xlu1 %1344 }
  0xf7   : > { %1388 = vst.msk [vmem:[#allocation2 + $0x2c] sm:$0xf] %vm1376_vm9, %v1345_v50  ;;  %v1343_v0 = vpop.permute.xlu0 %1342  ;;  %v677_v5 = vrot.slane %v675_v20, 4  ;;  %v1930_v50 = vsel %vm3135_vm2, %v1928_v42, %v1929_v29  ;;  %v1055_v29 = vshrl.u32 %v952_v52, 16 }
  0xf8   : > { %1387 = vst.msk [vmem:[#allocation2 + $0x28] sm:$0xf] %vm1376_vm9, %v1343_v0  ;;  %1785 = vrot.lane.b32.xlu1 %v1670_v30, %s2793_s10  ;;  %v1933_v30 = vsel %vm3135_vm2, %v1931_v51, %v1932_v4  ;;  %v701_v0 = vrot.slane %v699_v45, 4  ;;  %v795_v51 = vld [vmem:[%s2863_s29 + $0x50] sm:$0x1] }
  0xf9   : > { %1783 = vrot.lane.b32.xlu0 %v1660_v39, %s2793_s10  ;;  %v674_v39 = vrot.slane %v672_v58, 4  ;;  %v679_v47 = vsel %vm2947_vm5, %v677_v5, %v678_v40  ;;  %v794_v58 = vld [vmem:[%s2863_s29 + $0x4c] sm:$0xf]  ;;  %v843_v40 = vrot.slane %v841_v24, 4 }
  0xfa   : > { %v1495_v13 = vpop.permute.xlu1 %1494  ;;  %v865_v12 = vrot.slane %v794_v58, 5 }
  0xfb   : > { %1546 = vst.msk [vmem:[#allocation2 + $0xc] sm:$0xf] %vm1542_vm10, %v1495_v13  ;;  %v1493_v18 = vpop.permute.xlu0 %1492  ;;  %v1058_v13 = vshll.u32 %v952_v52, 16  ;;  %v676_v10 = vsel %vm2947_vm5, %v674_v39, %v675_v20  ;;  %v1057_v20 = vrot.slane %v1055_v29, 5  ;;  %v868_v39 = vrot.slane %v795_v51, 5 }
  0xfc   : > { %1545 = vst.msk [vmem:[#allocation2 + $0x8] sm:$0xf] %vm1542_vm10, %v1493_v18  ;;  %1801 = vrot.lane.b32.xlu1 %v1750_v15, %s2793_s10  ;;  %v702_v15 = vrot.slane %v626_v28, 5  ;;  %v960_v18 = vld [vmem:[%s2863_s29 + $0x4c] sm:$0xf]  ;;  %v1145_v52 = vshrl.u32 %v961_v63, 16  ;;  %v866_v35 = vsel %vm2947_vm5, %v864_v1, %v865_v12 }
  0xfd   : > { %1799 = vrot.lane.b32.xlu0 %v1740_v43, %s2793_s10  ;;  %v1135_v59 = vshrl.u32 %v960_v18, 16  ;;  %v1316_v1 = vrot.slane %v1314_v38, 4 }
  0xfe   : > { %v1511_v27 = vpop.permute.xlu1 %1510  ;;  %v703_v25 = vsel %vm2947_vm5, %v701_v0, %v702_v15  ;;  %v1148_v0 = vshll.u32 %v961_v63, 16  ;;  %v1243_v63 = vld [vmem:[%s2863_s29 + $0x4c] sm:$0xf] }
  0xff   : > { %1554 = vst.msk [vmem:[#allocation2 + $0x2c] sm:$0xf] %vm1542_vm10, %v1511_v27  ;;  %v1509_v34 = vpop.permute.xlu0 %1508  ;;  %v1060_v27 = vrot.slane %v1058_v13, 6 }
 0x100   : > { %1553 = vst.msk [vmem:[#allocation2 + $0x28] sm:$0xf] %vm1542_vm10, %v1509_v34  ;;  %1954 = vrot.lane.b32.xlu1 %v1909_v55, %s2794_s11  ;;  %v700_v34 = vsel %vm2947_vm5, %v698_v17, %v699_v45  ;;  %v1150_v17 = vrot.slane %v1148_v0, 6  ;;  %v1578_v0 = vld [vmem:[%s2863_s29 + $0x54] sm:$0xf] }
 0x101   : > { %1952 = vrot.lane.b32.xlu0 %v1906_v14, %s2794_s11  ;;  %v1138_v14 = vshll.u32 %v960_v18, 16  ;;  %v1061_v45 = vor.u32 %v1060_v27, %v1057_v20  ;;  %v1235_v18 = vld [vmem:[%s2863_s29 + $0x2c] sm:$0xf]  ;;  %v1133_v27 = vrot.slane %v3668_v16, 4  ;;  %v1756_v38 = vshll.u32 %v1578_v0, 16 }
 0x102   : > { %v1778_v53 = vpop.permute.xlu1 %1777  ;;  %v1293_v51 = vrot.slane %v1235_v18, 6  ;;  %v1579_v18 = vld [vmem:[%s2863_s29 + $0x58] sm:$0x7] }
 0x103   : > { %1829 = vst.msk [vmem:[#allocation2 + $0xc] sm:$0xf] %vm1825_vm13, %v1778_v53  ;;  %v1776_v9 = vpop.permute.xlu0 %1775  ;;  %v845_v53 = vsel %vm2947_vm5, %v843_v40, %v4223_v44  ;;  %v1063_v13 = vrot.slane %v1061_v45, 4  ;;  %v1062_v20 = vsel %vm3035_vm11, %v1053_v49, %v1061_v45  ;;  %v1292_v44 = vrot.slane %v1290_v61, 4  ;;  %v1412_v45 = vld [vmem:[%s2863_s29 + $0x54] sm:$0xf] }
 0x104   : > { %1828 = vst.msk [vmem:[#allocation2 + $0x8] sm:$0xf] %vm1825_vm13, %v1776_v9  ;;  %1970 = vrot.lane.b32.xlu1 %v1933_v30, %s2794_s11  ;;  %v4222_v30 = vrot.slane %v3596_v60, 5  ;;  %v1137_v60 = vrot.slane %v1135_v59, 5  ;;  %v1140_v9 = vrot.slane %v1138_v14, 6  ;;  %v1295_v14 = vrot.slane %v1293_v51, 4 }
 0x105   : > { %1968 = vrot.lane.b32.xlu0 %v1930_v50, %s2794_s11  ;;  %v867_v50 = vrot.slane %v865_v12, 4  ;;  %v1072_v31 = vsel %vm3035_vm11, %v1063_v13, %v3207_v56  ;;  %v1753_v13 = vshrl.u32 %v1578_v0, 16  ;;  %v1458_v49 = vrot.slane %v1456_v22, 4  ;;  %v1862_v0 = vld [vmem:[%s2863_s29 + $0x58] sm:$0x7] }
 0x106   : > { %v1794_v43 = vpop.permute.xlu1 %1793  ;;  %v840_v5 = vrot.slane %v4222_v30, 4  ;;  %v1404_v30 = vld [vmem:[%s2863_s29 + $0x34] sm:$0xf]  ;;  %v1297_v11 = vsel %vm3053_vm12, %v1295_v14, %v4224_v36  ;;  %v1758_v22 = vrot.slane %v1756_v38, 7 }
 0x107   : > { %1837 = vst.msk [vmem:[#allocation2 + $0x2c] sm:$0xf] %vm1825_vm13, %v1794_v43  ;;  %v1792_v55 = vpop.permute.xlu0 %1791  ;;  %v869_v29 = vsel %vm2947_vm5, %v867_v50, %v868_v39  ;;  %v1141_v43 = vor.u32 %v1140_v9, %v1137_v60 }
 0x108   : > { %1836 = vst.msk [vmem:[#allocation2 + $0x28] sm:$0xf] %vm1825_vm13, %v1792_v55  ;;  %722 = vrot.lane.b32.xlu1 %v679_v47, %s2788_s5  ;;  %v842_v47 = vsel %vm2947_vm5, %v840_v5, %v841_v24  ;;  %vm2438_vm5 = vcmask 64512  }
 0x109   : > { %720 = vrot.lane.b32.xlu0 %v676_v10, %s2788_s5  ;;  %v1147_v10 = vrot.slane %v1145_v52, 5  ;;  %v1143_v40 = vrot.slane %v1141_v43, 4  ;;  %v1459_v52 = vrot.slane %v1404_v30, 6  ;;  %v1671_v30 = vrot.slane %v3759_v21, 4 }
 0x10a   : > { %v1947_v42 = vpop.permute.xlu1 %1946 }
 0x10b   : > { %1998 = vst.msk [vmem:[#allocation2 + $0xc] sm:$0xf] %vm1994_vm14, %v1947_v42  ;;  %v1945_v28 = vpop.permute.xlu0 %1944  ;;  %v1151_v46 = vor.u32 %v1150_v17, %v1147_v10  ;;  %v1244_v42 = vld [vmem:[%s2863_s29 + $0x50] sm:$0x3]  ;;  %v1461_v7 = vrot.slane %v1459_v52, 4 }
 0x10c   : > { %1997 = vst.msk [vmem:[#allocation2 + $0x8] sm:$0xf] %vm1994_vm14, %v1945_v28  ;;  %738 = vrot.lane.b32.xlu1 %v703_v25, %s2788_s5  ;;  %v1142_v28 = vsel %vm3035_vm11, %v1133_v27, %v1141_v43  ;;  %v1320_v39 = vrot.slane %v1244_v42, 6  ;;  %v1413_v10 = vld [vmem:[%s2863_s29 + $0x58] sm:$0x3] }
 0x10d   : > { %736 = vrot.lane.b32.xlu0 %v700_v34, %s2788_s5  ;;  %v1152_v16 = vsel %vm3035_vm11, %v1143_v40, %v1151_v46  ;;  %v1317_v34 = vrot.slane %v1243_v63, 6  ;;  %v1486_v46 = vrot.slane %v1413_v10, 6  ;;  %v1460_v63 = vsel %vm3053_vm12, %v1458_v49, %v1459_v52  ;;  %v2036_v10 = vld [vmem:[%s4011_s28] sm:$0xff] }
 0x10e   : > { %v1963_v15 = vpop.permute.xlu1 %1962  ;;  %v1751_v52 = vrot.slane %v3773_v62, 4  ;;  %v2040_v49 = vld [vmem:[%s4011_s28 + $0x20] sm:$0xff] }
 0x10f   : > { %2006 = vst.msk [vmem:[#allocation2 + $0x2c] sm:$0xf] %vm1994_vm14, %v1963_v15  ;;  %v1961_v58 = vpop.permute.xlu0 %1960  ;;  %v1319_v61 = vrot.slane %v1317_v34, 4 }
 0x110   : > { %2005 = vst.msk [vmem:[#allocation2 + $0x28] sm:$0xf] %vm1994_vm14, %v1961_v58  ;;  %888 = vrot.lane.b32.xlu1 %v845_v53, %s2789_s6  ;;  %v1570_v53 = vld [vmem:[%s2863_s29 + $0x34] sm:$0xf] }
 0x111   : > { %886 = vrot.lane.b32.xlu0 %v842_v47, %s2789_s6  ;;  %v1673_v60 = vshrl.u32 %v1570_v53, 16  ;;  %v1676_v9 = vshll.u32 %v1570_v53, 16  ;;  %v1294_v47 = vsel %vm3053_vm12, %v1292_v44, %v1293_v51  ;;  %v1321_v43 = vsel %vm3053_vm12, %v1319_v61, %v1320_v39 }
 0x112   : > { %v731_v24 = vpop.permute.xlu1 %730  ;;  %v1755_v51 = vrot.slane %v1753_v13, 6 }
 0x113   : > { %772 = vst.msk [vmem:[#allocation2 + $0x34] sm:$0xf] %vm758_vm6, %v731_v24  ;;  %v729_v55 = vpop.permute.xlu0 %728  ;;  %v2739_v25 = vld [vmem:[#allocation2 + $0x8] sm:$0xff]   ;;  %v1675_v17 = vrot.slane %v1673_v60, 6  ;;  %v1678_v57 = vrot.slane %v1676_v9, 7  ;;  %v1910_v9 = vrot.slane %v1908_v54, 4 }
 0x114   : > { %771 = vst.msk [vmem:[#allocation2 + $0x30] sm:$0xf] %vm758_vm6, %v729_v55  ;;  %904 = vrot.lane.b32.xlu1 %v869_v29, %s2789_s6  ;;  %2641 = vmatmul.mubr.msk.bf16.gmra.mxu0 %vm2204_vm0, %v2739_v25  ;;  %v1483_v29 = vrot.slane %v1412_v45, 6  ;;  %v4225_v25 = vrot.slane %v3265_v41, 6  ;;  %v1482_v41 = vrot.slane %v1480_v3, 4  ;;  %v1759_v14 = vor.u32 %v1758_v22, %v1755_v51  ;;  %v2043_v51 = vld [vmem:[%s4011_s28 + $0x38] sm:$0xff] }
 0x115   : > { %902 = vrot.lane.b32.xlu0 %v866_v35, %s2789_s6  ;;  %2644 = vmatprep.mubr.msk.bf16.mxu0 %vm2796_vm4, %v2795_v6  ;;  %v1318_v35 = vsel %vm3053_vm12, %v1316_v1, %v1317_v34  ;;  %v1679_v23 = vor.u32 %v1678_v57, %v1675_v17  ;;  %v1861_v45 = vld [vmem:[%s2863_s29 + $0x54] sm:$0xf]  ;;  %v1938_v54 = vrot.slane %v1862_v0, 7 }
 0x116   : > { %v881_v12 = vpop.permute.xlu1 %880  ;;  %v1485_v40 = vrot.slane %v1483_v29, 4  ;;  %v1484_v3 = vsel %vm3053_vm12, %v1482_v41, %v1483_v29  ;;  %v1761_v21 = vrot.slane %v1759_v14, 4  ;;  %v1935_v61 = vrot.slane %v1861_v45, 7  ;;  %v2038_v57 = vld [vmem:[%s4011_s28 + $0x10] sm:$0xff] }
 0x117   : > { %930 = vst.msk [vmem:[#allocation2 + $0x14] sm:$0xf] %vm924_vm7, %v881_v12  ;;  %v879_v59 = vpop.permute.xlu0 %878  ;;  %v2740_v56 = vld [vmem:[#allocation2 + $0x28] sm:$0xff]   ;;  %v1763_v12 = vshrl.u32 %v1579_v18, 16  ;;  %v1680_v39 = vsel %vm3101_vm15, %v1671_v30, %v1679_v23  ;;  %v1760_v62 = vsel %vm3101_vm15, %v1751_v52, %v1759_v14  ;;  %v2046_v41 = vld [vmem:[%s4011_s28 + $0x50] sm:$0xff]  ;;  %v2048_v14 = vld [vmem:[%s4011_s28 + $0x60] sm:$0xff] }
 0x118   : > { %929 = vst.msk [vmem:[#allocation2 + $0x10] sm:$0xf] %vm924_vm7, %v879_v59  ;;  %1171 = vrot.lane.b32.xlu1 %v1072_v31, %s2790_s7  ;;  %2657 = vmatmul.mubr.msk.bf16.vlgmr.msra.gmra.mxu1 %vm2204_vm0, %v2740_v56  ;;  %v1463_v31 = vsel %vm3053_vm12, %v1461_v7, %v4225_v25  ;;  %v1487_v56 = vsel %vm3053_vm12, %v1485_v40, %v1486_v46  ;;  %v1937_v33 = vrot.slane %v1935_v61, 4  ;;  %v1934_v7 = vrot.slane %v1932_v4, 4  ;;  %v2042_v40 = vld [vmem:[%s4011_s28 + $0x30] sm:$0xff] }
 0x119   : > { %1169 = vrot.lane.b32.xlu0 %v1062_v20, %s2790_s7  ;;  %2660 = vmatprep.mubr.msk.bf16.mxu1 %vm2796_vm4, %v2795_v6  ;;  %v1766_v20 = vshll.u32 %v1579_v18, 16  ;;  %v1765_v42 = vrot.slane %v1763_v12, 6  ;;  %v2044_v12 = vld [vmem:[%s4011_s28 + $0x40] sm:$0xff] }
 0x11a   : > { %v897_v5 = vpop.permute.xlu1 %896 }
 0x11b   : > { %938 = vst.msk [vmem:[#allocation2 + $0x34] sm:$0xf] %vm924_vm7, %v897_v5  ;;  %v895_v50 = vpop.permute.xlu0 %894  ;;  %v1768_v34 = vrot.slane %v1766_v20, 7  ;;  %v1853_v5 = vld [vmem:[%s2863_s29 + $0x34] sm:$0xf] }
 0x11c   : > { %937 = vst.msk [vmem:[#allocation2 + $0x30] sm:$0xf] %vm924_vm7, %v895_v50  ;;  %1187 = vrot.lane.b32.xlu1 %v1152_v16, %s2790_s7  ;;  %v1681_v16 = vrot.slane %v1679_v23, 4  ;;  %v1911_v53 = vrot.slane %v1853_v5, 7  ;;  %v2051_v5 = vld [vmem:[%s4011_s28 + $0x78] sm:$0xff] }
 0x11d   : > { %1185 = vrot.lane.b32.xlu0 %v1142_v28, %s2790_s7  ;;  %v1769_v44 = vor.u32 %v1768_v34, %v1765_v42  ;;  %v2049_v34 = vld [vmem:[%s4011_s28 + $0x68] sm:$0xff]  ;;  %s4119_s7 = scalar_lea.vmem %s4204_s4, %s2587_s25 }
 0x11e   : > { %v1164_v15 = vpop.permute.xlu1 %1163  ;;  %v1690_v48 = vsel %vm3101_vm15, %v1681_v16, %v3308_v2 }
 0x11f   : > { %1213 = vst.msk [vmem:[#allocation2 + $0x14] sm:$0xf] %vm1207_vm8, %v1164_v15  ;;  %v1162_v58 = vpop.permute.xlu0 %1161  ;;  %v1770_v2 = vsel %vm3101_vm15, %v1761_v21, %v1769_v44 }
 0x120   : > { %1212 = vst.msk [vmem:[#allocation2 + $0x10] sm:$0xf] %vm1207_vm8, %v1162_v58  ;;  %1340 = vrot.lane.b32.xlu1 %v1297_v11, %s2791_s8  ;;  %v1913_v11 = vrot.slane %v1911_v53, 4  ;;  %v1912_v58 = vsel %vm3135_vm2, %v1910_v9, %v1911_v53  ;;  %v2052_v53 = vld [vmem:[%s4011_s28 + $0x80] sm:$0xff] }
 0x121   : > { %1338 = vrot.lane.b32.xlu0 %v1294_v47, %s2791_s8  ;;  %v4227_v47 = vrot.slane %v3331_v32, 7  ;;  %v1939_v32 = vsel %vm3135_vm2, %v1937_v33, %v1938_v54 }
 0x122   : > { %v1180_v24 = vpop.permute.xlu1 %1179 }
 0x123   : > { %1221 = vst.msk [vmem:[#allocation2 + $0x34] sm:$0xf] %vm1207_vm8, %v1180_v24  ;;  %v1178_v55 = vpop.permute.xlu0 %1177  ;;  %v1915_v19 = vsel %vm3135_vm2, %v1913_v11, %v4227_v47  ;;  %v2039_v24 = vld [vmem:[%s4011_s28 + $0x18] sm:$0xff] }
 0x124   : > { %1220 = vst.msk [vmem:[#allocation2 + $0x30] sm:$0xf] %vm1207_vm8, %v1178_v55  ;;  %1356 = vrot.lane.b32.xlu1 %v1321_v43, %s2791_s8  ;;  %v1936_v43 = vsel %vm3135_vm2, %v1934_v7, %v1935_v61  ;;  %v2041_v55 = vld [vmem:[%s4011_s28 + $0x28] sm:$0xff] }
 0x125   : > { %1354 = vrot.lane.b32.xlu0 %v1318_v35, %s2791_s8 }
 0x126   : > { %v1333_v27 = vpop.permute.xlu1 %1332 }
 0x127   : > { %1382 = vst.msk [vmem:[#allocation2 + $0x14] sm:$0xf] %vm1376_vm9, %v1333_v27  ;;  %v1331_v59 = vpop.permute.xlu0 %1330  ;;  %v2045_v27 = vld [vmem:[%s4011_s28 + $0x48] sm:$0xff] }
 0x128   : > { %1381 = vst.msk [vmem:[#allocation2 + $0x10] sm:$0xf] %vm1376_vm9, %v1331_v59  ;;  %1506 = vrot.lane.b32.xlu1 %v1463_v31, %s2792_s9 }
 0x129   : > { %1504 = vrot.lane.b32.xlu0 %v1460_v63, %s2792_s9 }
 0x12a   : > { %v1349_v8 = vpop.permute.xlu1 %1348 }
 0x12b   : > { %1390 = vst.msk [vmem:[#allocation2 + $0x34] sm:$0xf] %vm1376_vm9, %v1349_v8  ;;  %v1347_v28 = vpop.permute.xlu0 %1346 }
 0x12c   : > { %1389 = vst.msk [vmem:[#allocation2 + $0x30] sm:$0xf] %vm1376_vm9, %v1347_v28  ;;  %1522 = vrot.lane.b32.xlu1 %v1487_v56, %s2792_s9  ;;  %v2047_v56 = vld [vmem:[%s4011_s28 + $0x58] sm:$0xff] }
 0x12d   : > { %1520 = vrot.lane.b32.xlu0 %v1484_v3, %s2792_s9  ;;  %v2050_v3 = vld [vmem:[%s4011_s28 + $0x70] sm:$0xff] }
 0x12e   : > { %v1499_v50 = vpop.permute.xlu1 %1498 }
 0x12f   : > { %1548 = vst.msk [vmem:[#allocation2 + $0x14] sm:$0xf] %vm1542_vm10, %v1499_v50  ;;  %v1497_v36 = vpop.permute.xlu0 %1496  ;;  %v2053_v50 = vld [vmem:[%s4011_s28 + $0x88] sm:$0xff] }
 0x130   : > { %1547 = vst.msk [vmem:[#allocation2 + $0x10] sm:$0xf] %vm1542_vm10, %v1497_v36  ;;  %1789 = vrot.lane.b32.xlu1 %v1690_v48, %s2793_s10 }
 0x131   : > { %1787 = vrot.lane.b32.xlu0 %v1680_v39, %s2793_s10 }
 0x132   : > { %v1515_v60 = vpop.permute.xlu1 %1514 }
 0x133   : > { %1556 = vst.msk [vmem:[#allocation2 + $0x34] sm:$0xf] %vm1542_vm10, %v1515_v60  ;;  %v1513_v15 = vpop.permute.xlu0 %1512 }
 0x134   : > { %1555 = vst.msk [vmem:[#allocation2 + $0x30] sm:$0xf] %vm1542_vm10, %v1513_v15  ;;  %1805 = vrot.lane.b32.xlu1 %v1770_v2, %s2793_s10 }
 0x135   : > { %1803 = vrot.lane.b32.xlu0 %v1760_v62, %s2793_s10 }
 0x136   : > { %v1782_v1 = vpop.permute.xlu1 %1781 }
 0x137   : > { %1831 = vst.msk [vmem:[#allocation2 + $0x14] sm:$0xf] %vm1825_vm13, %v1782_v1  ;;  %v1780_v29 = vpop.permute.xlu0 %1779 }
 0x138   : > { %1830 = vst.msk [vmem:[#allocation2 + $0x10] sm:$0xf] %vm1825_vm13, %v1780_v29  ;;  %1958 = vrot.lane.b32.xlu1 %v1915_v19, %s2794_s11 }
 0x139   : > { %1956 = vrot.lane.b32.xlu0 %v1912_v58, %s2794_s11 }
 0x13a   : > { %v1798_v13 = vpop.permute.xlu1 %1797 }
 0x13b   : > { %1839 = vst.msk [vmem:[#allocation2 + $0x34] sm:$0xf] %vm1825_vm13, %v1798_v13  ;;  %v1796_v26 = vpop.permute.xlu0 %1795 }
 0x13c   : > { %1838 = vst.msk [vmem:[#allocation2 + $0x30] sm:$0xf] %vm1825_vm13, %v1796_v26  ;;  %1974 = vrot.lane.b32.xlu1 %v1939_v32, %s2794_s11 }
 0x13d   : > { %1972 = vrot.lane.b32.xlu0 %v1936_v43, %s2794_s11 }
 0x13e   : > { %v1951_v4 = vpop.permute.xlu1 %1950 }
 0x13f   : > { %2000 = vst.msk [vmem:[#allocation2 + $0x14] sm:$0xf] %vm1994_vm14, %v1951_v4  ;;  %v1949_v17 = vpop.permute.xlu0 %1948 }
 0x140   : > { %1999 = vst.msk [vmem:[#allocation2 + $0x10] sm:$0xf] %vm1994_vm14, %v1949_v17  ;;  %2061 = vperm.xlu1 %2734, %v2037_v37  }
 0x141   : > { %2056 = vperm.xlu0 %2733, %v2036_v10  }
 0x142   : > { %v1967_v38 = vpop.permute.xlu1 %1966 }
 0x143   : > { %2008 = vst.msk [vmem:[#allocation2 + $0x34] sm:$0xf] %vm1994_vm14, %v1967_v38  ;;  %v1965_v35 = vpop.permute.xlu0 %1964 }
 0x144   : > { %2007 = vst.msk [vmem:[#allocation2 + $0x30] sm:$0xf] %vm1994_vm14, %v1965_v35  ;;  %2066 = vperm.xlu1 %2734, %v2038_v57  }
 0x145   : > { %2071 = vperm.xlu0 %2733, %v2039_v24  }
 0x146   : > { %v735_v18 = vpop.permute.xlu1 %734 }
 0x147   : > { %774 = vst.msk [vmem:[#allocation2 + $0x3c] sm:$0xf] %vm758_vm6, %v735_v18  ;;  %v733_v25 = vpop.permute.xlu0 %732  ;;  %v2741_v31 = vld [vmem:[#allocation2 + $0x10] sm:$0xff]  }
 0x148   : > { %773 = vst.msk [vmem:[#allocation2 + $0x38] sm:$0xf] %vm758_vm6, %v733_v25  ;;  %2076 = vperm.xlu1 %2734, %v2040_v49   ;;  %2645 = vmatmul.mubr.msk.bf16.gmra.mxu0 %vm2204_vm0, %v2741_v31 }
 0x149   : > { %2081 = vperm.xlu0 %2733, %v2041_v55   ;;  %2648 = vmatprep.mubr.msk.bf16.mxu0 %vm2796_vm4, %v2795_v6 }
 0x14a   : > { %v885_v46 = vpop.permute.xlu1 %884 }
 0x14b   : > { %932 = vst.msk [vmem:[#allocation2 + $0x1c] sm:$0xf] %vm924_vm7, %v885_v46  ;;  %v883_v23 = vpop.permute.xlu0 %882  ;;  %v2742_v22 = vld [vmem:[#allocation2 + $0x30] sm:$0xff]  }
 0x14c   : > { %931 = vst.msk [vmem:[#allocation2 + $0x18] sm:$0xf] %vm924_vm7, %v883_v23  ;;  %2086 = vperm.xlu1 %2734, %v2042_v40   ;;  %2661 = vmatmul.mubr.msk.bf16.gmra.mxu1 %vm2204_vm0, %v2742_v22 }
 0x14d   : > { %2091 = vperm.xlu0 %2733, %v2043_v51   ;;  %2664 = vmatprep.mubr.msk.bf16.mxu1 %vm2796_vm4, %v2795_v6 }
 0x14e   : > { %v901_v20 = vpop.permute.xlu1 %900 }
 0x14f   : > { %940 = vst.msk [vmem:[#allocation2 + $0x3c] sm:$0xf] %vm924_vm7, %v901_v20  ;;  %v899_v63 = vpop.permute.xlu0 %898 }
 0x150   : > { %939 = vst.msk [vmem:[#allocation2 + $0x38] sm:$0xf] %vm924_vm7, %v899_v63  ;;  %2096 = vperm.xlu1 %2734, %v2044_v12  }
 0x151   : > { %2101 = vperm.xlu0 %2733, %v2045_v27  }
 0x152   : > { %v1168_v59 = vpop.permute.xlu1 %1167 }
 0x153   : > { %1215 = vst.msk [vmem:[#allocation2 + $0x1c] sm:$0xf] %vm1207_vm8, %v1168_v59  ;;  %v1166_v16 = vpop.permute.xlu0 %1165 }
 0x154   : > { %1214 = vst.msk [vmem:[#allocation2 + $0x18] sm:$0xf] %vm1207_vm8, %v1166_v16  ;;  %2106 = vperm.xlu1 %2734, %v2046_v41   ;;  %v4110_v41 = vld [vmem:[%s4203_s3] ss:$0 sm:$0xff] }
 0x155   : > { %2111 = vperm.xlu0 %2733, %v2047_v56  }
 0x156   : > { %v1184_v42 = vpop.permute.xlu1 %1183 }
 0x157   : > { %1223 = vst.msk [vmem:[#allocation2 + $0x3c] sm:$0xf] %vm1207_vm8, %v1184_v42  ;;  %v1182_v8 = vpop.permute.xlu0 %1181 }
 0x158   : > { %1222 = vst.msk [vmem:[#allocation2 + $0x38] sm:$0xf] %vm1207_vm8, %v1182_v8  ;;  %2116 = vperm.xlu1 %2734, %v2048_v14  }
 0x159   : > { %2121 = vperm.xlu0 %2733, %v2049_v34  }
 0x15a   : > { %v1337_v30 = vpop.permute.xlu1 %1336 }
 0x15b   : > { %1384 = vst.msk [vmem:[#allocation2 + $0x1c] sm:$0xf] %vm1376_vm9, %v1337_v30  ;;  %v1335_v28 = vpop.permute.xlu0 %1334 }
 0x15c   : > { %1383 = vst.msk [vmem:[#allocation2 + $0x18] sm:$0xf] %vm1376_vm9, %v1335_v28  ;;  %2126 = vperm.xlu1 %2734, %v2050_v3  }
 0x15d   : > { %2131 = vperm.xlu0 %2733, %v2051_v5  }
 0x15e   : > { %v1353_v48 = vpop.permute.xlu1 %1352 }
 0x15f   : > { %1392 = vst.msk [vmem:[#allocation2 + $0x3c] sm:$0xf] %vm1376_vm9, %v1353_v48  ;;  %v1351_v21 = vpop.permute.xlu0 %1350 }
 0x160   : > { %1391 = vst.msk [vmem:[#allocation2 + $0x38] sm:$0xf] %vm1376_vm9, %v1351_v21  ;;  %2136 = vperm.xlu1 %2734, %v2052_v53  }
 0x161   : > { %2141 = vperm.xlu0 %2733, %v2053_v50  }
 0x162   : > { %v1503_v44 = vpop.permute.xlu1 %1502 }
 0x163   : > { %1550 = vst.msk [vmem:[#allocation2 + $0x1c] sm:$0xf] %vm1542_vm10, %v1503_v44  ;;  %v1501_v39 = vpop.permute.xlu0 %1500 }
 0x164   : > { %1549 = vst.msk [vmem:[#allocation2 + $0x18] sm:$0xf] %vm1542_vm10, %v1501_v39 }
 0x166   : > { %v1519_v52 = vpop.permute.xlu1 %1518 }
 0x167   : > { %1558 = vst.msk [vmem:[#allocation2 + $0x3c] sm:$0xf] %vm1542_vm10, %v1519_v52  ;;  %v1517_v45 = vpop.permute.xlu0 %1516 }
 0x168   : > { %1557 = vst.msk [vmem:[#allocation2 + $0x38] sm:$0xf] %vm1542_vm10, %v1517_v45 }
 0x16a   : > { %v1786_v36 = vpop.permute.xlu1 %1785 }
 0x16b   : > { %1833 = vst.msk [vmem:[#allocation2 + $0x1c] sm:$0xf] %vm1825_vm13, %v1786_v36  ;;  %v1784_v2 = vpop.permute.xlu0 %1783 }
 0x16c   : > { %1832 = vst.msk [vmem:[#allocation2 + $0x18] sm:$0xf] %vm1825_vm13, %v1784_v2 }
 0x16e   : > { %v1802_v11 = vpop.permute.xlu1 %1801 }
 0x16f   : > { %1841 = vst.msk [vmem:[#allocation2 + $0x3c] sm:$0xf] %vm1825_vm13, %v1802_v11  ;;  %v1800_v61 = vpop.permute.xlu0 %1799 }
 0x170   : > { %1840 = vst.msk [vmem:[#allocation2 + $0x38] sm:$0xf] %vm1825_vm13, %v1800_v61 }
 0x172   : > { %v1955_v60 = vpop.permute.xlu1 %1954 }
 0x173   : > { %2002 = vst.msk [vmem:[#allocation2 + $0x1c] sm:$0xf] %vm1994_vm14, %v1955_v60  ;;  %v1953_v62 = vpop.permute.xlu0 %1952 }
 0x174   : > { %2001 = vst.msk [vmem:[#allocation2 + $0x18] sm:$0xf] %vm1994_vm14, %v1953_v62 }
 0x176   : > { %v1971_v9 = vpop.permute.xlu1 %1970 }
 0x177   : > { %2010 = vst.msk [vmem:[#allocation2 + $0x3c] sm:$0xf] %vm1994_vm14, %v1971_v9  ;;  %v1969_v0 = vpop.permute.xlu0 %1968 }
 0x178   : > { %2009 = vst.msk [vmem:[#allocation2 + $0x38] sm:$0xf] %vm1994_vm14, %v1969_v0 }
 0x17a   : > { %v723_v15 = vpop.permute.xlu1 %722 }
 0x17b   : > { %768 = vst.msk [vmem:[#allocation2 + $0x24] sm:$0xf] %vm758_vm6, %v723_v15  ;;  %v721_v47 = vpop.permute.xlu0 %720  ;;  %v2743_v19 = vld [vmem:[#allocation2 + $0x18] sm:$0xff]  }
 0x17c   : > { %767 = vst.msk [vmem:[#allocation2 + $0x20] sm:$0xf] %vm758_vm6, %v721_v47  ;;  %2649 = vmatmul.mubr.msk.bf16.gmra.mxu0 %vm2204_vm0, %v2743_v19 }
 0x17d   : > { %2652 = vmatprep.mubr.msk.bf16.mxu0 %vm2796_vm4, %v2795_v6 }
 0x17e   : > { %v739_v33 = vpop.permute.xlu1 %738 }
 0x17f   : > { %776 = vst.msk [vmem:[#allocation2 + $0x44] sm:$0xf] %vm758_vm6, %v739_v33  ;;  %v737_v54 = vpop.permute.xlu0 %736  ;;  %v2744_v1 = vld [vmem:[#allocation2 + $0x38] sm:$0xff]  }
 0x180   : > { %775 = vst.msk [vmem:[#allocation2 + $0x40] sm:$0xf] %vm758_vm6, %v737_v54  ;;  %2665 = vmatmul.mubr.msk.bf16.gmra.mxu1 %vm2204_vm0, %v2744_v1 }
 0x181   : > { %2668 = vmatprep.mubr.msk.bf16.mxu1 %vm2796_vm4, %v2795_v6 }
 0x182   : > { %v889_v58 = vpop.permute.xlu1 %888 }
 0x183   : > { %934 = vst.msk [vmem:[#allocation2 + $0x24] sm:$0xf] %vm924_vm7, %v889_v58  ;;  %v887_v7 = vpop.permute.xlu0 %886 }
 0x184   : > { %933 = vst.msk [vmem:[#allocation2 + $0x20] sm:$0xf] %vm924_vm7, %v887_v7 }
 0x186   : > { %v905_v29 = vpop.permute.xlu1 %904 }
 0x187   : > { %942 = vst.msk [vmem:[#allocation2 + $0x44] sm:$0xf] %vm924_vm7, %v905_v29  ;;  %v903_v32 = vpop.permute.xlu0 %902 }
 0x188   : > { %941 = vst.msk [vmem:[#allocation2 + $0x40] sm:$0xf] %vm924_vm7, %v903_v32 }
 0x18a   : > { %v1172_v13 = vpop.permute.xlu1 %1171 }
 0x18b   : > { %1217 = vst.msk [vmem:[#allocation2 + $0x24] sm:$0xf] %vm1207_vm8, %v1172_v13  ;;  %v1170_v43 = vpop.permute.xlu0 %1169 }
 0x18c   : > { %1216 = vst.msk [vmem:[#allocation2 + $0x20] sm:$0xf] %vm1207_vm8, %v1170_v43 }
 0x18e   : > { %v1188_v26 = vpop.permute.xlu1 %1187 }
 0x18f   : > { %1225 = vst.msk [vmem:[#allocation2 + $0x44] sm:$0xf] %vm1207_vm8, %v1188_v26  ;;  %v1186_v6 = vpop.permute.xlu0 %1185 }
 0x190   : > { %1224 = vst.msk [vmem:[#allocation2 + $0x40] sm:$0xf] %vm1207_vm8, %v1186_v6 }
 0x192   : > { %v1341_v37 = vpop.permute.xlu1 %1340 }
 0x193   : > { %1386 = vst.msk [vmem:[#allocation2 + $0x24] sm:$0xf] %vm1376_vm9, %v1341_v37  ;;  %v1339_v4 = vpop.permute.xlu0 %1338 }
 0x194   : > { %1385 = vst.msk [vmem:[#allocation2 + $0x20] sm:$0xf] %vm1376_vm9, %v1339_v4 }
 0x196   : > { %v1357_v10 = vpop.permute.xlu1 %1356 }
 0x197   : > { %1394 = vst.msk [vmem:[#allocation2 + $0x44] sm:$0xf] %vm1376_vm9, %v1357_v10  ;;  %v1355_v17 = vpop.permute.xlu0 %1354 }
 0x198   : > { %1393 = vst.msk [vmem:[#allocation2 + $0x40] sm:$0xf] %vm1376_vm9, %v1355_v17 }
 0x19a   : > { %v1507_v57 = vpop.permute.xlu1 %1506 }
 0x19b   : > { %1552 = vst.msk [vmem:[#allocation2 + $0x24] sm:$0xf] %vm1542_vm10, %v1507_v57  ;;  %v1505_v38 = vpop.permute.xlu0 %1504 }
 0x19c   : > { %1551 = vst.msk [vmem:[#allocation2 + $0x20] sm:$0xf] %vm1542_vm10, %v1505_v38 }
 0x19e   : > { %v1523_v24 = vpop.permute.xlu1 %1522 }
 0x19f   : > { %1560 = vst.msk [vmem:[#allocation2 + $0x44] sm:$0xf] %vm1542_vm10, %v1523_v24  ;;  %v1521_v35 = vpop.permute.xlu0 %1520 }
 0x1a0   : > { %1559 = vst.msk [vmem:[#allocation2 + $0x40] sm:$0xf] %vm1542_vm10, %v1521_v35 }
 0x1a2   : > { %v1790_v49 = vpop.permute.xlu1 %1789 }
 0x1a3   : > { %1835 = vst.msk [vmem:[#allocation2 + $0x24] sm:$0xf] %vm1825_vm13, %v1790_v49  ;;  %v1788_v18 = vpop.permute.xlu0 %1787 }
 0x1a4   : > { %1834 = vst.msk [vmem:[#allocation2 + $0x20] sm:$0xf] %vm1825_vm13, %v1788_v18  ;;  %v2270_v55 = vpop.f32.mrf.mxu0 }
 0x1a6   : > { %v1806_v25 = vpop.permute.xlu1 %1805  ;;  %v2638_v40 = vpop.f32.mrf.mxu0 }
 0x1a7   : > { %1843 = vst.msk [vmem:[#allocation2 + $0x44] sm:$0xf] %vm1825_vm13, %v1806_v25  ;;  %v1804_v31 = vpop.permute.xlu0 %1803 }
 0x1a8   : > { %1842 = vst.msk [vmem:[#allocation2 + $0x40] sm:$0xf] %vm1825_vm13, %v1804_v31  ;;  %v2273_v46 = vpop.f32.mrf.mxu0 }
 0x1aa   : > { %v1959_v51 = vpop.permute.xlu1 %1958  ;;  %v2639_v22 = vpop.f32.mrf.mxu0 }
 0x1ab   : > { %2004 = vst.msk [vmem:[#allocation2 + $0x24] sm:$0xf] %vm1994_vm14, %v1959_v51  ;;  %v1957_v23 = vpop.permute.xlu0 %1956 }
 0x1ac   : > { %2003 = vst.msk [vmem:[#allocation2 + $0x20] sm:$0xf] %vm1994_vm14, %v1957_v23 }
 0x1ae   : > { %v1975_v12 = vpop.permute.xlu1 %1974 }
 0x1af   : > { %2012 = vst.msk [vmem:[#allocation2 + $0x44] sm:$0xf] %vm1994_vm14, %v1975_v12  ;;  %v1973_v20 = vpop.permute.xlu0 %1972 }
 0x1b0   : > { %2011 = vst.msk [vmem:[#allocation2 + $0x40] sm:$0xf] %vm1994_vm14, %v1973_v20 }
 0x1b3   : > { %v2745_v27 = vld [vmem:[#allocation2 + $0x20] sm:$0xff]  }
 0x1b4   : > { %2653 = vmatmul.mubr.msk.bf16.gmra.mxu0 %vm2204_vm0, %v2745_v27 }
 0x1b7   : > { %v2746_v63 = vld [vmem:[#allocation2 + $0x40] sm:$0xff]  }
 0x1b8   : > { %2669 = vmatmul.mubr.msk.bf16.gmra.mxu1 %vm2204_vm0, %v2746_v63 }
 0x1bb   : > { %v2062_v59 = vpop.permute.xlu1 %2061 }
 0x1bc   : > { %v2274_v56 = vadd.f32 %v2273_v46, %v2062_v59  ;;  %v2057_v16 = vpop.permute.xlu0 %2056 }
 0x1bd   : > { %v2271_v14 = vadd.f32 %v2270_v55, %v2057_v16 }
 0x1be   : > { %v2349_v42 = vadd.f32 %v4110_v41, %v2274_v56 }
 0x1bf   : > { %v2348_v34 = vadd.f32 %v4110_v41, %v2271_v14  ;;  %v2067_v30 = vpop.permute.xlu1 %2066 }
 0x1c0   : > { %vm2367_vm11 = vcmp.ge.f32.partialorder %v2349_v42, 0.0  ;;  %v2385_v8 = vmul.f32 1.4142135, %v2349_v42  ;;  %v2403_v3 = vmul.f32 0.28284273, %v2349_v42  ;;  %v2072_v21 = vpop.permute.xlu0 %2071 }
 0x1c1   : > { %vm2366_vm12 = vcmp.ge.f32.partialorder %v2348_v34, 0.0  ;;  %v2384_v5 = vmul.f32 1.4142135, %v2348_v34  ;;  %v2402_v28 = vmul.f32 0.28284273, %v2348_v34 }
 0x1c2   : > { %v2421_v48 = vsel %vm2367_vm11, %v2385_v8, %v2403_v3 }
 0x1c3   : > { %2440 = vst.msk [vmem:[%s4119_s7 + $0x8] sm:$0xff] %vm2438_vm5, %v2421_v48  ;;  %v2420_v44 = vsel %vm2366_vm12, %v2384_v5, %v2402_v28  ;;  %v2077_v53 = vpop.permute.xlu1 %2076 }
 0x1c4   : > { %2439 = vst.msk [vmem:[%s4119_s7] sm:$0xff] %vm2438_vm5, %v2420_v44  ;;  %v2082_v50 = vpop.permute.xlu0 %2081 }
 0x1c7   : > { %v4125_v39 = vpop.permute.xlu1 %2086 }
 0x1c8   : > { %v4127_v52 = vpop.permute.xlu0 %2091 }
 0x1cb   : > { %v4129_v45 = vpop.permute.xlu1 %2096 }
 0x1cc   : > { %v4131_v36 = vpop.permute.xlu0 %2101 }
 0x1cf   : > { %v2107_v62 = vpop.permute.xlu1 %2106 }
 0x1d0   : > { %v2112_v33 = vpop.permute.xlu0 %2111 }
 0x1d3   : > { %v2117_v40 = vpop.permute.xlu1 %2116 }
 0x1d4   : > { %v2278_v2 = vpop.f32.mrf.mxu0  ;;  %v2122_v20 = vpop.permute.xlu0 %2121 }
 0x1d5   : > { %v2279_v11 = vadd.f32 %v2278_v2, %v2067_v30 }
 0x1d6   : > { %v2642_v61 = vpop.f32.mrf.mxu0 }
 0x1d7   : > { %v2350_v60 = vadd.f32 %v4110_v41, %v2279_v11 }
 0x1d8   : > { %v2281_v9 = vpop.f32.mrf.mxu0  ;;  %v2310_v0 = vpop.f32.mrf.mxu1 }
 0x1d9   : > { %vm2368_vm15 = vcmp.ge.f32.partialorder %v2350_v60, 0.0  ;;  %v2386_v15 = vmul.f32 1.4142135, %v2350_v60  ;;  %v2404_v47 = vmul.f32 0.28284273, %v2350_v60  ;;  %v2282_v19 = vadd.f32 %v2281_v9, %v2072_v21  ;;  %v2127_v9 = vpop.permute.xlu1 %2126 }
 0x1da   : > { %v2311_v54 = vadd.f32 %v2310_v0, %v2107_v62  ;;  %v2643_v1 = vpop.f32.mrf.mxu0  ;;  %v2658_v58 = vpop.f32.mrf.mxu1 }
 0x1db   : > { %v2422_v7 = vsel %vm2368_vm15, %v2386_v15, %v2404_v47  ;;  %v2351_v29 = vadd.f32 %v4110_v41, %v2282_v19 }
 0x1dc   : > { %2441 = vst.msk [vmem:[%s4119_s7 + $0x10] sm:$0xff] %vm2438_vm5, %v2422_v7  ;;  %v2358_v32 = vadd.f32 %v4110_v41, %v2311_v54  ;;  %v2313_v13 = vpop.f32.mrf.mxu1  ;;  %v2132_v54 = vpop.permute.xlu0 %2131 }
 0x1dd   : > { %vm2369_vm1 = vcmp.ge.f32.partialorder %v2351_v29, 0.0  ;;  %v2387_v43 = vmul.f32 1.4142135, %v2351_v29  ;;  %v2405_v26 = vmul.f32 0.28284273, %v2351_v29  ;;  %v2314_v6 = vadd.f32 %v2313_v13, %v2112_v33 }
 0x1de   : > { %vm2376_vm2 = vcmp.ge.f32.partialorder %v2358_v32, 0.0  ;;  %v2394_v37 = vmul.f32 1.4142135, %v2358_v32  ;;  %v2412_v4 = vmul.f32 0.28284273, %v2358_v32  ;;  %v2659_v10 = vpop.f32.mrf.mxu1 }
 0x1df   : > { %v2423_v17 = vsel %vm2369_vm1, %v2387_v43, %v2405_v26  ;;  %v2359_v57 = vadd.f32 %v4110_v41, %v2314_v6 }
 0x1e0   : > { %2442 = vst.msk [vmem:[%s4119_s7 + $0x18] sm:$0xff] %vm2438_vm5, %v2423_v17  ;;  %v2430_v38 = vsel %vm2376_vm2, %v2394_v37, %v2412_v4 }
 0x1e1   : > { %2449 = vst.msk [vmem:[%s4119_s7 + $0x50] sm:$0xff] %vm2438_vm5, %v2430_v38  ;;  %vm2377_vm3 = vcmp.ge.f32.partialorder %v2359_v57, 0.0  ;;  %v2395_v24 = vmul.f32 1.4142135, %v2359_v57  ;;  %v2413_v35 = vmul.f32 0.28284273, %v2359_v57 }
 0x1e3   : > { %v2431_v49 = vsel %vm2377_vm3, %v2395_v24, %v2413_v35 }
 0x1e4   : > { %2450 = vst.msk [vmem:[%s4119_s7 + $0x58] sm:$0xff] %vm2438_vm5, %v2431_v49 }
 0x208   : > { %v2286_v18 = vpop.f32.mrf.mxu0 }
 0x209   : > { %v2287_v55 = vadd.f32 %v2286_v18, %v2077_v53 }
 0x20a   : > { %v2646_v25 = vpop.f32.mrf.mxu0 }
 0x20b   : > { %v2352_v31 = vadd.f32 %v4110_v41, %v2287_v55 }
 0x20c   : > { %v2289_v46 = vpop.f32.mrf.mxu0  ;;  %v2318_v51 = vpop.f32.mrf.mxu1 }
 0x20d   : > { %vm2370_vm4 = vcmp.ge.f32.partialorder %v2352_v31, 0.0  ;;  %v2388_v23 = vmul.f32 1.4142135, %v2352_v31  ;;  %v2406_v22 = vmul.f32 0.28284273, %v2352_v31  ;;  %v2290_v12 = vadd.f32 %v2289_v46, %v2082_v50  ;;  %v2137_v46 = vpop.permute.xlu1 %2136 }
 0x20e   : > { %v2319_v27 = vadd.f32 %v2318_v51, %v2117_v40  ;;  %v2647_v63 = vpop.f32.mrf.mxu0  ;;  %v2662_v59 = vpop.f32.mrf.mxu1 }
 0x20f   : > { %v2424_v56 = vsel %vm2370_vm4, %v2388_v23, %v2406_v22  ;;  %v2353_v16 = vadd.f32 %v4110_v41, %v2290_v12 }
 0x210   : > { %2443 = vst.msk [vmem:[%s4119_s7 + $0x20] sm:$0xff] %vm2438_vm5, %v2424_v56  ;;  %v2360_v14 = vadd.f32 %v4110_v41, %v2319_v27  ;;  %v2321_v42 = vpop.f32.mrf.mxu1 }
 0x211   : > { %vm2371_vm6 = vcmp.ge.f32.partialorder %v2353_v16, 0.0  ;;  %v2389_v34 = vmul.f32 1.4142135, %v2353_v16  ;;  %v2407_v8 = vmul.f32 0.28284273, %v2353_v16  ;;  %v2322_v3 = vadd.f32 %v2321_v42, %v2122_v20 }
 0x212   : > { %vm2378_vm7 = vcmp.ge.f32.partialorder %v2360_v14, 0.0  ;;  %v2396_v30 = vmul.f32 1.4142135, %v2360_v14  ;;  %v2414_v5 = vmul.f32 0.28284273, %v2360_v14  ;;  %v2663_v28 = vpop.f32.mrf.mxu1 }
 0x213   : > { %v2425_v48 = vsel %vm2371_vm6, %v2389_v34, %v2407_v8  ;;  %v2361_v21 = vadd.f32 %v4110_v41, %v2322_v3 }
 0x214   : > { %2444 = vst.msk [vmem:[%s4119_s7 + $0x28] sm:$0xff] %vm2438_vm5, %v2425_v48  ;;  %v2432_v44 = vsel %vm2378_vm7, %v2396_v30, %v2414_v5 }
 0x215   : > { %2451 = vst.msk [vmem:[%s4119_s7 + $0x60] sm:$0xff] %vm2438_vm5, %v2432_v44  ;;  %vm2379_vm8 = vcmp.ge.f32.partialorder %v2361_v21, 0.0  ;;  %v2397_v53 = vmul.f32 1.4142135, %v2361_v21  ;;  %v2415_v50 = vmul.f32 0.28284273, %v2361_v21 }
 0x217   : > { %v2433_v2 = vsel %vm2379_vm8, %v2397_v53, %v2415_v50 }
 0x218   : > { %2452 = vst.msk [vmem:[%s4119_s7 + $0x68] sm:$0xff] %vm2438_vm5, %v2433_v2 }
 0x23c   : > { %v2294_v11 = vpop.f32.mrf.mxu0 }
 0x23d   : > { %v2295_v61 = vadd.f32 %v2294_v11, %v4125_v39 }
 0x23e   : > { %v2650_v60 = vpop.f32.mrf.mxu0 }
 0x23f   : > { %v2354_v62 = vadd.f32 %v4110_v41, %v2295_v61 }
 0x240   : > { %v2297_v0 = vpop.f32.mrf.mxu0  ;;  %v2326_v15 = vpop.f32.mrf.mxu1 }
 0x241   : > { %vm2372_vm9 = vcmp.ge.f32.partialorder %v2354_v62, 0.0  ;;  %v2390_v47 = vmul.f32 1.4142135, %v2354_v62  ;;  %v2408_v19 = vmul.f32 0.28284273, %v2354_v62  ;;  %v2298_v33 = vadd.f32 %v2297_v0, %v4127_v52 }
 0x242   : > { %v2327_v1 = vadd.f32 %v2326_v15, %v2127_v9  ;;  %v2651_v58 = vpop.f32.mrf.mxu0  ;;  %v2666_v7 = vpop.f32.mrf.mxu1 }
 0x243   : > { %v2426_v29 = vsel %vm2372_vm9, %v2390_v47, %v2408_v19  ;;  %v2355_v39 = vadd.f32 %v4110_v41, %v2298_v33 }
 0x244   : > { %2445 = vst.msk [vmem:[%s4119_s7 + $0x30] sm:$0xff] %vm2438_vm5, %v2426_v29  ;;  %v2362_v32 = vadd.f32 %v4110_v41, %v2327_v1  ;;  %v2329_v13 = vpop.f32.mrf.mxu1 }
 0x245   : > { %vm2373_vm10 = vcmp.ge.f32.partialorder %v2355_v39, 0.0  ;;  %v2391_v43 = vmul.f32 1.4142135, %v2355_v39  ;;  %v2409_v26 = vmul.f32 0.28284273, %v2355_v39  ;;  %v2330_v6 = vadd.f32 %v2329_v13, %v2132_v54 }
 0x246   : > { %vm2380_vm13 = vcmp.ge.f32.partialorder %v2362_v32, 0.0  ;;  %v2398_v52 = vmul.f32 1.4142135, %v2362_v32  ;;  %v2416_v37 = vmul.f32 0.28284273, %v2362_v32  ;;  %v2667_v4 = vpop.f32.mrf.mxu1 }
 0x247   : > { %v2427_v10 = vsel %vm2373_vm10, %v2391_v43, %v2409_v26  ;;  %v2363_v17 = vadd.f32 %v4110_v41, %v2330_v6 }
 0x248   : > { %2446 = vst.msk [vmem:[%s4119_s7 + $0x38] sm:$0xff] %vm2438_vm5, %v2427_v10  ;;  %v2434_v57 = vsel %vm2380_vm13, %v2398_v52, %v2416_v37 }
 0x249   : > { %2453 = vst.msk [vmem:[%s4119_s7 + $0x70] sm:$0xff] %vm2438_vm5, %v2434_v57  ;;  %vm2381_vm14 = vcmp.ge.f32.partialorder %v2363_v17, 0.0  ;;  %v2399_v38 = vmul.f32 1.4142135, %v2363_v17  ;;  %v2417_v24 = vmul.f32 0.28284273, %v2363_v17 }
 0x24b   : > { %v2435_v35 = vsel %vm2381_vm14, %v2399_v38, %v2417_v24 }
 0x24c   : > { %2454 = vst.msk [vmem:[%s4119_s7 + $0x78] sm:$0xff] %vm2438_vm5, %v2435_v35 }
 0x274   : > { %v2302_v49 = vpop.f32.mrf.mxu0 }
 0x275   : > { %v2303_v18 = vadd.f32 %v2302_v49, %v4129_v45  ;;  %v2142_v45 = vpop.permute.xlu0 %2141 }
 0x276   : > { %v2654_v55 = vpop.f32.mrf.mxu0 }
 0x277   : > { %v2356_v25 = vadd.f32 %v4110_v41, %v2303_v18 }
 0x278   : > { %v2305_v31 = vpop.f32.mrf.mxu0  ;;  %v2334_v40 = vpop.f32.mrf.mxu1 }
 0x279   : > { %vm2374_vm0 = vcmp.ge.f32.partialorder %v2356_v25, 0.0  ;;  %v2392_v51 = vmul.f32 1.4142135, %v2356_v25  ;;  %v2410_v23 = vmul.f32 0.28284273, %v2356_v25  ;;  %v2306_v22 = vadd.f32 %v2305_v31, %v4131_v36 }
 0x27a   : > { %v2335_v12 = vadd.f32 %v2334_v40, %v2137_v46  ;;  %v2655_v20 = vpop.f32.mrf.mxu0  ;;  %v2670_v27 = vpop.f32.mrf.mxu1 }
 0x27b   : > { %v2428_v63 = vsel %vm2374_vm0, %v2392_v51, %v2410_v23  ;;  %v2357_v59 = vadd.f32 %v4110_v41, %v2306_v22 }
 0x27c   : > { %2447 = vst.msk [vmem:[%s4119_s7 + $0x40] sm:$0xff] %vm2438_vm5, %v2428_v63  ;;  %v2364_v56 = vadd.f32 %v4110_v41, %v2335_v12  ;;  %v2337_v16 = vpop.f32.mrf.mxu1 }
 0x27d   : > { %vm2375_vm11 = vcmp.ge.f32.partialorder %v2357_v59, 0.0  ;;  %v2393_v14 = vmul.f32 1.4142135, %v2357_v59  ;;  %v2411_v42 = vmul.f32 0.28284273, %v2357_v59  ;;  %v2338_v34 = vadd.f32 %v2337_v16, %v2142_v45 }
 0x27e   : > { %vm2382_vm12 = vcmp.ge.f32.partialorder %v2364_v56, 0.0  ;;  %v2400_v36 = vmul.f32 1.4142135, %v2364_v56  ;;  %v2418_v8 = vmul.f32 0.28284273, %v2364_v56  ;;  %v2671_v3 = vpop.f32.mrf.mxu1 }
 0x27f   : > { %v2429_v30 = vsel %vm2375_vm11, %v2393_v14, %v2411_v42  ;;  %v2365_v5 = vadd.f32 %v4110_v41, %v2338_v34 }
 0x280   : > { %2448 = vst.msk [vmem:[%s4119_s7 + $0x48] sm:$0xff] %vm2438_vm5, %v2429_v30  ;;  %v2436_v28 = vsel %vm2382_vm12, %v2400_v36, %v2418_v8 }
 0x281   : > { %2455 = vst.msk [vmem:[%s4119_s7 + $0x80] sm:$0xff] %vm2438_vm5, %v2436_v28  ;;  %vm2383_vm15 = vcmp.ge.f32.partialorder %v2365_v5, 0.0  ;;  %v2401_v48 = vmul.f32 1.4142135, %v2365_v5  ;;  %v2419_v21 = vmul.f32 0.28284273, %v2365_v5 }
 0x283   : > { %v2437_v44 = vsel %vm2383_vm15, %v2401_v48, %v2419_v21 }
 0x284   : > { %2456 = vst.msk [vmem:[%s4119_s7 + $0x88] sm:$0xff] %vm2438_vm5, %v2437_v44 }
 0x285 PF: > { %s14_s19 = sadd.s32 1, %s2785_s19   ;;  %s4228_s15 = smov %s2777_s17 }
 0x286   : > { %p11_p8 = scmp.ge.s32.totalorder %s14_s19, 6   ;;  %s4229_s16 = smov %s2781_s18 }
 0x287   : > { %s4230_s17 = smov %s4233_s20  ;;  %s4231_s18 = smov %s4237_s21 }
 0x288   :  { %13 = sbr.rel (!%p11_p8) target bundleno = 3 (0x3), region = 72 }

</bundles_post_ra>
